<compile_context>
chip_gen: v6e
topology: v6e:2x2x1
jax: 0.10.0
libtpu: 0.0.40
codegen_flags: <defaults>
</compile_context>

<pallas_src>
import math
from functools import partial

import jax
import jax.numpy as jnp
from jax.experimental import pallas as pl
from jax.experimental.pallas import tpu as pltpu

# ---------------- model config (small, synthetic) ----------------
VOCAB = 100          # vocab size
TYPES = 2            # token type vocab
B = 2                # batch
S = 8                # sequence length (max_seq_length analogue)
H = 32               # hidden size
NH = 2               # attention heads
HD = H // NH         # head dim
F = 64               # FFN intermediate size
L = 2                # number of encoder layers
EPS = 1e-12          # BERT layernorm eps
NEG_INF = -1e9

assert 4 * H == 128 and 2 * H + F == 128, "pvec packing assumes 4H == 2H+F == 128"


# ---------------- in-kernel helpers (all f32) ----------------
def _layernorm(x, gamma, beta):
    # fused statistics: one data pass, var = E[x^2] - mu^2
    mu = jnp.mean(x, axis=-1, keepdims=True)
    ms = jnp.mean(x * x, axis=-1, keepdims=True)
    var = ms - mu * mu
    return (x - mu) * jax.lax.rsqrt(var + EPS) * gamma + beta


def _gelu(x):
    # tanh-approximation GELU (EUP-friendly).
    # TODO(synk): exact erf GELU if bitwise HF-BERT parity is ever required.
    c = math.sqrt(2.0 / math.pi)
    return 0.5 * x * (1.0 + jnp.tanh(c * (x + 0.044715 * x * x * x)))


# ---------------- fused embedding + encoder kernel ----------------
def fused_bert_kernel(ids_ref, tt_ref, mask_ref,
                      wemb_ref, pemb_ref, temb_ref, embln_ref,
                      wqkv_ref, bqkv_ref, wo_ref, w1_ref, w2_ref, pvec_ref,
                      o_ref, x_sc):
    # ---- fused embedding gather (word + type), rows assembled in VMEM scratch ----
    for i in range(B * S):                                   # static unroll (16 rows)
        tok = ids_ref[i]                                     # SMEM scalar reads
        tti = tt_ref[i]
        x_sc[pl.ds(i, 1), :] = (wemb_ref[pl.ds(tok, 1), :]   # dynamic row gathers from VMEM
                                + temb_ref[pl.ds(tti, 1), :])
    pos = jnp.concatenate([pemb_ref[...]] * B, axis=0)       # [B*S, H] position rows
    x = _layernorm(x_sc[...] + pos, embln_ref[0:1, :], embln_ref[1:2, :])

    # ---- additive key-mask bias built in-kernel (one VPU op) ----
    maskf = mask_ref[...].astype(jnp.float32)                # [B, 1, S]
    bias = (1.0 - maskf) * NEG_INF                           # [B, 1, S]
    bias_hb = jnp.concatenate([bias] * NH, axis=0)           # [NH*B, 1, S], batch order (h, b)

    for l in range(L):                                       # static unroll over layers
        wqkv = wqkv_ref[l]                                   # [H, 3H]  bf16 (scale folded into Q)
        bqkv = bqkv_ref[l]                                   # [1, 3H]  f32
        wo = wo_ref[l]                                       # [H, H]   bf16
        w1 = w1_ref[l]                                       # [H, F]   bf16
        w2 = w2_ref[l]                                       # [F, H]   bf16
        pv = pvec_ref[l]                                     # [2, 128] f32 lane-dense param slab
        bo    = pv[0:1, 0:H]
        ln1_g = pv[0:1, H:2 * H]
        ln1_b = pv[0:1, 2 * H:3 * H]
        b2    = pv[0:1, 3 * H:4 * H]
        ln2_g = pv[1:2, 0:H]
        ln2_b = pv[1:2, H:2 * H]
        b1    = pv[1:2, 2 * H:2 * H + F]

        # --- fused QKV projection (one MXU matmul) ---
        qkv = jnp.dot(x.astype(jnp.bfloat16), wqkv,
                      preferred_element_type=jnp.float32) + bqkv     # [B*S, 3H] f32

        def heads(base):
            # static slices + stack only: [B*S, H]-block -> heads-as-batch [NH*B, S, HD]
            return jnp.stack(
                [qkv[b * S:(b + 1) * S, base + h * HD: base + (h + 1) * HD]
                 for h in range(NH) for b in range(B)],
                axis=0).astype(jnp.bfloat16)

        q3 = heads(0)           # [NH*B, S, HD]
        k3 = heads(H)
        v3 = heads(2 * H)

        # --- one scores einsum / one softmax / one ctx einsum for ALL heads ---
        s = jnp.einsum("bqd,bkd->bqk", q3, k3,
                       preferred_element_type=jnp.float32) + bias_hb  # [NH*B, S, S]
        s = s - jnp.max(s, axis=-1, keepdims=True)
        p = jnp.exp(s)
        p = p * pl.reciprocal(jnp.sum(p, axis=-1, keepdims=True), approx=True)
        ctx = jnp.einsum("bqk,bkd->bqd", p.astype(jnp.bfloat16), v3,
                         preferred_element_type=jnp.float32)          # [NH*B, S, HD] f32

        # reassemble heads along lanes (cheap sub-128 concat) -> single output projection
        cat = jnp.concatenate(
            [jnp.concatenate([ctx[h * B + b] for h in range(NH)], axis=-1)
             for b in range(B)], axis=0)                              # [B*S, H]
        attn = jnp.dot(cat.astype(jnp.bfloat16), wo,
                       preferred_element_type=jnp.float32) + bo

        x = _layernorm(x + attn, ln1_g, ln1_b)

        # --- feed forward ---
        h1 = jnp.dot(x.astype(jnp.bfloat16), w1,
                     preferred_element_type=jnp.float32) + b1
        h1 = _gelu(h1)
        ffn = jnp.dot(h1.astype(jnp.bfloat16), w2,
                      preferred_element_type=jnp.float32) + b2
        x = _layernorm(x + ffn, ln2_g, ln2_b)

    o_ref[...] = x.astype(o_ref.dtype)                               # [B*S, H]


# ---------------- wrapper ----------------
def fused_bert_pallas(p, input_ids, attention_mask, token_type_ids):
    b, s = input_ids.shape
    bs = b * s
    ids = input_ids.reshape(-1).astype(jnp.int32)                    # SMEM scalars
    tts = token_type_ids.reshape(-1).astype(jnp.int32)               # SMEM scalars
    mask = attention_mask.reshape(b, 1, s).astype(jnp.int32)         # raw mask; bias built in-kernel

    args = (ids, tts, mask,
            p["word_emb"], p["pos_emb"], p["type_emb"], p["emb_ln"],
            p["wqkv"], p["bqkv"], p["wo"], p["w1"], p["w2"], p["pvec"])

    per_layer_flops = (2 * bs * H * 3 * H                            # fused QKV
                       + NH * b * (2 * s * s * HD) * 2               # scores + p@v
                       + 2 * bs * H * H                              # output projection
                       + 2 * bs * H * F + 2 * bs * F * H)            # FFN
    flops = L * per_layer_flops + 2 * bs * H
    transcendentals = L * (NH * b * s * s + bs * F) + (2 * L + 1) * bs
    bytes_accessed = sum(int(a.size) * a.dtype.itemsize for a in args) + bs * H * 4

    smem = pl.BlockSpec(memory_space=pltpu.MemorySpace.SMEM)
    vmem = pl.BlockSpec(memory_space=pltpu.MemorySpace.VMEM)

    out2 = pl.pallas_call(
        fused_bert_kernel,
        out_shape=jax.ShapeDtypeStruct((bs, H), jnp.float32),
        in_specs=[smem, smem] + [vmem] * (len(args) - 2),
        out_specs=vmem,
        scratch_shapes=[pltpu.VMEM((bs, H), jnp.float32)],           # embedding-row assembly buffer
        cost_estimate=pl.CostEstimate(flops=flops,
                                      transcendentals=transcendentals,
                                      bytes_accessed=bytes_accessed),
        # footprint < 100 KiB; right-sized limit (defaults are 16-32 MiB scoped)
        compiler_params=pltpu.CompilerParams(vmem_limit_bytes=4 * 1024 * 1024),
    )(*args)
    return out2.reshape(b, s, H)                                     # wrapper-side layout plumbing


# ---------------- parameter init (deterministic, synthetic, pre-packed) ----------------
def init_params(key):
    std = 0.02
    ks = iter(jax.random.split(key, 3 + L * 6))
    nrm = lambda shape: jax.random.normal(next(ks), shape, jnp.float32) * std

    word_emb = nrm((VOCAB, H))
    pos_emb = nrm((S, H))
    type_emb = nrm((TYPES, H))
    emb_ln = jnp.stack([jnp.ones((H,), jnp.float32),
                        jnp.zeros((H,), jnp.float32)])               # [2, H] (gamma; beta)

    scale = 1.0 / math.sqrt(HD)
    wqkv_l, bqkv_l, wo_l, w1_l, w2_l, pvec_l = [], [], [], [], [], []
    for _ in range(L):
        wq, wk, wv = nrm((H, H)), nrm((H, H)), nrm((H, H))
        bq = jnp.zeros((H,), jnp.float32)
        bk = jnp.zeros((H,), jnp.float32)
        bv = jnp.zeros((H,), jnp.float32)
        wo = nrm((H, H)); bo = jnp.zeros((H,), jnp.float32)
        w1 = nrm((H, F)); b1 = jnp.zeros((F,), jnp.float32)
        w2 = nrm((F, H)); b2 = jnp.zeros((H,), jnp.float32)
        ln1_g = jnp.ones((H,), jnp.float32); ln1_b = jnp.zeros((H,), jnp.float32)
        ln2_g = jnp.ones((H,), jnp.float32); ln2_b = jnp.zeros((H,), jnp.float32)

        # fold 1/sqrt(HD) into the Q projection (weights + bias)
        wqkv_l.append(jnp.concatenate([wq * scale, wk, wv], axis=1))       # [H, 3H]
        bqkv_l.append(jnp.concatenate([bq * scale, bk, bv])[None, :])      # [1, 3H]
        wo_l.append(wo); w1_l.append(w1); w2_l.append(w2)
        # lane-dense param slab: row0 = [bo | ln1_g | ln1_b | b2], row1 = [ln2_g | ln2_b | b1]
        row0 = jnp.concatenate([bo, ln1_g, ln1_b, b2])                     # [128]
        row1 = jnp.concatenate([ln2_g, ln2_b, b1])                         # [128]
        pvec_l.append(jnp.stack([row0, row1]))                             # [2, 128]

    return {
        "word_emb": word_emb, "pos_emb": pos_emb, "type_emb": type_emb,
        "emb_ln": emb_ln,
        "wqkv": jnp.stack(wqkv_l).astype(jnp.bfloat16),                    # [L, H, 3H]
        "bqkv": jnp.stack(bqkv_l).astype(jnp.float32),                     # [L, 1, 3H]
        "wo": jnp.stack(wo_l).astype(jnp.bfloat16),                        # [L, H, H]
        "w1": jnp.stack(w1_l).astype(jnp.bfloat16),                        # [L, H, F]
        "w2": jnp.stack(w2_l).astype(jnp.bfloat16),                        # [L, F, H]
        "pvec": jnp.stack(pvec_l).astype(jnp.float32),                     # [L, 2, 128]
    }


# ---------------- forward (mirrors Transformer.forward semantics) ----------------
@partial(jax.jit, static_argnums=())
def transformer_forward(params, input_ids, attention_mask, token_type_ids):
    x = fused_bert_pallas(params, input_ids, attention_mask, token_type_ids)

    token_embeddings = x                      # output_states[0]
    cls_tokens = x[:, 0, :]                   # output_tokens[:, 0, :]

    features = {
        "input_ids": input_ids,
        "attention_mask": attention_mask,
        "token_type_ids": token_type_ids,
        "token_embeddings": token_embeddings,
        "cls_token_embeddings": cls_tokens,
    }
    # TODO(synk): `output_hidden_states` / all_layer_embeddings branch omitted (config-dependent in HF).
    return features


if __name__ == "__main__":
    key = jax.random.PRNGKey(0)
    pkey, ikey = jax.random.split(key)
    params = init_params(pkey)

    input_ids = jax.random.randint(ikey, (B, S), 0, VOCAB, dtype=jnp.int32)
    attention_mask = jnp.array(
        [[1] * S, [1] * (S - 2) + [0, 0]], dtype=jnp.int32)   # second sequence has 2 pad tokens
    token_type_ids = jnp.zeros((B, S), dtype=jnp.int32)

    feats = transformer_forward(params, input_ids, attention_mask, token_type_ids)
    jax.block_until_ready(feats["token_embeddings"])
    jax.block_until_ready(feats["cls_token_embeddings"])

    assert feats["token_embeddings"].shape == (B, S, H)
    assert feats["cls_token_embeddings"].shape == (B, H)
    assert bool(jnp.all(jnp.isfinite(feats["token_embeddings"])))
    print("KERNEL_OK")
</pallas_src>

<mosaic_0001>
module attributes {stable_mosaic.version = 11 : i64} {
  func.func @fused_bert_kernel(%arg0: memref<16xi32, #tpu.memory_space<smem>>, %arg1: memref<16xi32, #tpu.memory_space<smem>>, %arg2: memref<2x1x8xi32, #tpu.memory_space<vmem>>, %arg3: memref<100x32xf32, #tpu.memory_space<vmem>>, %arg4: memref<8x32xf32, #tpu.memory_space<vmem>>, %arg5: memref<2x32xf32, #tpu.memory_space<vmem>>, %arg6: memref<2x32xf32, #tpu.memory_space<vmem>>, %arg7: memref<2x32x96xbf16, #tpu.memory_space<vmem>>, %arg8: memref<2x1x96xf32, #tpu.memory_space<vmem>>, %arg9: memref<2x32x32xbf16, #tpu.memory_space<vmem>>, %arg10: memref<2x32x64xbf16, #tpu.memory_space<vmem>>, %arg11: memref<2x64x32xbf16, #tpu.memory_space<vmem>>, %arg12: memref<2x2x128xf32, #tpu.memory_space<vmem>>, %arg13: memref<16x32xf32, #tpu.memory_space<vmem>>, %arg14: memref<16x32xf32, #tpu.memory_space<vmem>>) attributes {dimension_semantics = [], scalar_prefetch = 0 : i64, scratch_operands = 1 : i64, tpu.core_type = #tpu.core_type<tc>} {
    %c0 = arith.constant 0 : index
    %0 = memref.load %arg0[%c0] : memref<16xi32, #tpu.memory_space<smem>>
    %c0_0 = arith.constant 0 : index
    %1 = memref.load %arg1[%c0_0] : memref<16xi32, #tpu.memory_space<smem>>
    %2 = arith.index_cast %0 : i32 to index
    %c0_1 = arith.constant 0 : index
    %3 = vector.load %arg3[%2, %c0_1] : memref<100x32xf32, #tpu.memory_space<vmem>>, vector<1x32xf32>
    %4 = arith.index_cast %1 : i32 to index
    %c0_2 = arith.constant 0 : index
    %5 = vector.load %arg5[%4, %c0_2] : memref<2x32xf32, #tpu.memory_space<vmem>>, vector<1x32xf32>
    %6 = arith.addf %3, %5 : vector<1x32xf32>
    %c0_3 = arith.constant 0 : index
    %c0_4 = arith.constant 0 : index
    %7 = vector.load %arg14[%c0_3, %c0_4] : memref<16x32xf32, #tpu.memory_space<vmem>>, vector<1x32xf32>
    tpu.vector_store %arg14[%c0_3, %c0_4], %6 {strides = array<i32>} : memref<16x32xf32, #tpu.memory_space<vmem>>, vector<1x32xf32>,
    %c1 = arith.constant 1 : index
    %8 = memref.load %arg0[%c1] : memref<16xi32, #tpu.memory_space<smem>>
    %c1_5 = arith.constant 1 : index
    %9 = memref.load %arg1[%c1_5] : memref<16xi32, #tpu.memory_space<smem>>
    %10 = arith.index_cast %8 : i32 to index
    %c0_6 = arith.constant 0 : index
    %11 = vector.load %arg3[%10, %c0_6] : memref<100x32xf32, #tpu.memory_space<vmem>>, vector<1x32xf32>
    %12 = arith.index_cast %9 : i32 to index
    %c0_7 = arith.constant 0 : index
    %13 = vector.load %arg5[%12, %c0_7] : memref<2x32xf32, #tpu.memory_space<vmem>>, vector<1x32xf32>
    %14 = arith.addf %11, %13 : vector<1x32xf32>
    %c1_8 = arith.constant 1 : index
    %c0_9 = arith.constant 0 : index
    %15 = vector.load %arg14[%c1_8, %c0_9] : memref<16x32xf32, #tpu.memory_space<vmem>>, vector<1x32xf32>
    tpu.vector_store %arg14[%c1_8, %c0_9], %14 {strides = array<i32>} : memref<16x32xf32, #tpu.memory_space<vmem>>, vector<1x32xf32>,
    %c2 = arith.constant 2 : index
    %16 = memref.load %arg0[%c2] : memref<16xi32, #tpu.memory_space<smem>>
    %c2_10 = arith.constant 2 : index
    %17 = memref.load %arg1[%c2_10] : memref<16xi32, #tpu.memory_space<smem>>
    %18 = arith.index_cast %16 : i32 to index
    %c0_11 = arith.constant 0 : index
    %19 = vector.load %arg3[%18, %c0_11] : memref<100x32xf32, #tpu.memory_space<vmem>>, vector<1x32xf32>
    %20 = arith.index_cast %17 : i32 to index
    %c0_12 = arith.constant 0 : index
    %21 = vector.load %arg5[%20, %c0_12] : memref<2x32xf32, #tpu.memory_space<vmem>>, vector<1x32xf32>
    %22 = arith.addf %19, %21 : vector<1x32xf32>
    %c2_13 = arith.constant 2 : index
    %c0_14 = arith.constant 0 : index
    %23 = vector.load %arg14[%c2_13, %c0_14] : memref<16x32xf32, #tpu.memory_space<vmem>>, vector<1x32xf32>
    tpu.vector_store %arg14[%c2_13, %c0_14], %22 {strides = array<i32>} : memref<16x32xf32, #tpu.memory_space<vmem>>, vector<1x32xf32>,
    %c3 = arith.constant 3 : index
    %24 = memref.load %arg0[%c3] : memref<16xi32, #tpu.memory_space<smem>>
    %c3_15 = arith.constant 3 : index
    %25 = memref.load %arg1[%c3_15] : memref<16xi32, #tpu.memory_space<smem>>
    %26 = arith.index_cast %24 : i32 to index
    %c0_16 = arith.constant 0 : index
    %27 = vector.load %arg3[%26, %c0_16] : memref<100x32xf32, #tpu.memory_space<vmem>>, vector<1x32xf32>
    %28 = arith.index_cast %25 : i32 to index
    %c0_17 = arith.constant 0 : index
    %29 = vector.load %arg5[%28, %c0_17] : memref<2x32xf32, #tpu.memory_space<vmem>>, vector<1x32xf32>
    %30 = arith.addf %27, %29 : vector<1x32xf32>
    %c3_18 = arith.constant 3 : index
    %c0_19 = arith.constant 0 : index
    %31 = vector.load %arg14[%c3_18, %c0_19] : memref<16x32xf32, #tpu.memory_space<vmem>>, vector<1x32xf32>
    tpu.vector_store %arg14[%c3_18, %c0_19], %30 {strides = array<i32>} : memref<16x32xf32, #tpu.memory_space<vmem>>, vector<1x32xf32>,
    %c4 = arith.constant 4 : index
    %32 = memref.load %arg0[%c4] : memref<16xi32, #tpu.memory_space<smem>>
    %c4_20 = arith.constant 4 : index
    %33 = memref.load %arg1[%c4_20] : memref<16xi32, #tpu.memory_space<smem>>
    %34 = arith.index_cast %32 : i32 to index
    %c0_21 = arith.constant 0 : index
    %35 = vector.load %arg3[%34, %c0_21] : memref<100x32xf32, #tpu.memory_space<vmem>>, vector<1x32xf32>
    %36 = arith.index_cast %33 : i32 to index
    %c0_22 = arith.constant 0 : index
    %37 = vector.load %arg5[%36, %c0_22] : memref<2x32xf32, #tpu.memory_space<vmem>>, vector<1x32xf32>
    %38 = arith.addf %35, %37 : vector<1x32xf32>
    %c4_23 = arith.constant 4 : index
    %c0_24 = arith.constant 0 : index
    %39 = vector.load %arg14[%c4_23, %c0_24] : memref<16x32xf32, #tpu.memory_space<vmem>>, vector<1x32xf32>
    tpu.vector_store %arg14[%c4_23, %c0_24], %38 {strides = array<i32>} : memref<16x32xf32, #tpu.memory_space<vmem>>, vector<1x32xf32>,
    %c5 = arith.constant 5 : index
    %40 = memref.load %arg0[%c5] : memref<16xi32, #tpu.memory_space<smem>>
    %c5_25 = arith.constant 5 : index
    %41 = memref.load %arg1[%c5_25] : memref<16xi32, #tpu.memory_space<smem>>
    %42 = arith.index_cast %40 : i32 to index
    %c0_26 = arith.constant 0 : index
    %43 = vector.load %arg3[%42, %c0_26] : memref<100x32xf32, #tpu.memory_space<vmem>>, vector<1x32xf32>
    %44 = arith.index_cast %41 : i32 to index
    %c0_27 = arith.constant 0 : index
    %45 = vector.load %arg5[%44, %c0_27] : memref<2x32xf32, #tpu.memory_space<vmem>>, vector<1x32xf32>
    %46 = arith.addf %43, %45 : vector<1x32xf32>
    %c5_28 = arith.constant 5 : index
    %c0_29 = arith.constant 0 : index
    %47 = vector.load %arg14[%c5_28, %c0_29] : memref<16x32xf32, #tpu.memory_space<vmem>>, vector<1x32xf32>
    tpu.vector_store %arg14[%c5_28, %c0_29], %46 {strides = array<i32>} : memref<16x32xf32, #tpu.memory_space<vmem>>, vector<1x32xf32>,
    %c6 = arith.constant 6 : index
    %48 = memref.load %arg0[%c6] : memref<16xi32, #tpu.memory_space<smem>>
    %c6_30 = arith.constant 6 : index
    %49 = memref.load %arg1[%c6_30] : memref<16xi32, #tpu.memory_space<smem>>
    %50 = arith.index_cast %48 : i32 to index
    %c0_31 = arith.constant 0 : index
    %51 = vector.load %arg3[%50, %c0_31] : memref<100x32xf32, #tpu.memory_space<vmem>>, vector<1x32xf32>
    %52 = arith.index_cast %49 : i32 to index
    %c0_32 = arith.constant 0 : index
    %53 = vector.load %arg5[%52, %c0_32] : memref<2x32xf32, #tpu.memory_space<vmem>>, vector<1x32xf32>
    %54 = arith.addf %51, %53 : vector<1x32xf32>
    %c6_33 = arith.constant 6 : index
    %c0_34 = arith.constant 0 : index
    %55 = vector.load %arg14[%c6_33, %c0_34] : memref<16x32xf32, #tpu.memory_space<vmem>>, vector<1x32xf32>
    tpu.vector_store %arg14[%c6_33, %c0_34], %54 {strides = array<i32>} : memref<16x32xf32, #tpu.memory_space<vmem>>, vector<1x32xf32>,
    %c7 = arith.constant 7 : index
    %56 = memref.load %arg0[%c7] : memref<16xi32, #tpu.memory_space<smem>>
    %c7_35 = arith.constant 7 : index
    %57 = memref.load %arg1[%c7_35] : memref<16xi32, #tpu.memory_space<smem>>
    %58 = arith.index_cast %56 : i32 to index
    %c0_36 = arith.constant 0 : index
    %59 = vector.load %arg3[%58, %c0_36] : memref<100x32xf32, #tpu.memory_space<vmem>>, vector<1x32xf32>
    %60 = arith.index_cast %57 : i32 to index
    %c0_37 = arith.constant 0 : index
    %61 = vector.load %arg5[%60, %c0_37] : memref<2x32xf32, #tpu.memory_space<vmem>>, vector<1x32xf32>
    %62 = arith.addf %59, %61 : vector<1x32xf32>
    %c7_38 = arith.constant 7 : index
    %c0_39 = arith.constant 0 : index
    %63 = vector.load %arg14[%c7_38, %c0_39] : memref<16x32xf32, #tpu.memory_space<vmem>>, vector<1x32xf32>
    tpu.vector_store %arg14[%c7_38, %c0_39], %62 {strides = array<i32>} : memref<16x32xf32, #tpu.memory_space<vmem>>, vector<1x32xf32>,
    %c8 = arith.constant 8 : index
    %64 = memref.load %arg0[%c8] : memref<16xi32, #tpu.memory_space<smem>>
    %c8_40 = arith.constant 8 : index
    %65 = memref.load %arg1[%c8_40] : memref<16xi32, #tpu.memory_space<smem>>
    %66 = arith.index_cast %64 : i32 to index
    %c0_41 = arith.constant 0 : index
    %67 = vector.load %arg3[%66, %c0_41] : memref<100x32xf32, #tpu.memory_space<vmem>>, vector<1x32xf32>
    %68 = arith.index_cast %65 : i32 to index
    %c0_42 = arith.constant 0 : index
    %69 = vector.load %arg5[%68, %c0_42] : memref<2x32xf32, #tpu.memory_space<vmem>>, vector<1x32xf32>
    %70 = arith.addf %67, %69 : vector<1x32xf32>
    %c8_43 = arith.constant 8 : index
    %c0_44 = arith.constant 0 : index
    %71 = vector.load %arg14[%c8_43, %c0_44] : memref<16x32xf32, #tpu.memory_space<vmem>>, vector<1x32xf32>
    tpu.vector_store %arg14[%c8_43, %c0_44], %70 {strides = array<i32>} : memref<16x32xf32, #tpu.memory_space<vmem>>, vector<1x32xf32>,
    %c9 = arith.constant 9 : index
    %72 = memref.load %arg0[%c9] : memref<16xi32, #tpu.memory_space<smem>>
    %c9_45 = arith.constant 9 : index
    %73 = memref.load %arg1[%c9_45] : memref<16xi32, #tpu.memory_space<smem>>
    %74 = arith.index_cast %72 : i32 to index
    %c0_46 = arith.constant 0 : index
    %75 = vector.load %arg3[%74, %c0_46] : memref<100x32xf32, #tpu.memory_space<vmem>>, vector<1x32xf32>
    %76 = arith.index_cast %73 : i32 to index
    %c0_47 = arith.constant 0 : index
    %77 = vector.load %arg5[%76, %c0_47] : memref<2x32xf32, #tpu.memory_space<vmem>>, vector<1x32xf32>
    %78 = arith.addf %75, %77 : vector<1x32xf32>
    %c9_48 = arith.constant 9 : index
    %c0_49 = arith.constant 0 : index
    %79 = vector.load %arg14[%c9_48, %c0_49] : memref<16x32xf32, #tpu.memory_space<vmem>>, vector<1x32xf32>
    tpu.vector_store %arg14[%c9_48, %c0_49], %78 {strides = array<i32>} : memref<16x32xf32, #tpu.memory_space<vmem>>, vector<1x32xf32>,
    %c10 = arith.constant 10 : index
    %80 = memref.load %arg0[%c10] : memref<16xi32, #tpu.memory_space<smem>>
    %c10_50 = arith.constant 10 : index
    %81 = memref.load %arg1[%c10_50] : memref<16xi32, #tpu.memory_space<smem>>
    %82 = arith.index_cast %80 : i32 to index
    %c0_51 = arith.constant 0 : index
    %83 = vector.load %arg3[%82, %c0_51] : memref<100x32xf32, #tpu.memory_space<vmem>>, vector<1x32xf32>
    %84 = arith.index_cast %81 : i32 to index
    %c0_52 = arith.constant 0 : index
    %85 = vector.load %arg5[%84, %c0_52] : memref<2x32xf32, #tpu.memory_space<vmem>>, vector<1x32xf32>
    %86 = arith.addf %83, %85 : vector<1x32xf32>
    %c10_53 = arith.constant 10 : index
    %c0_54 = arith.constant 0 : index
    %87 = vector.load %arg14[%c10_53, %c0_54] : memref<16x32xf32, #tpu.memory_space<vmem>>, vector<1x32xf32>
    tpu.vector_store %arg14[%c10_53, %c0_54], %86 {strides = array<i32>} : memref<16x32xf32, #tpu.memory_space<vmem>>, vector<1x32xf32>,
    %c11 = arith.constant 11 : index
    %88 = memref.load %arg0[%c11] : memref<16xi32, #tpu.memory_space<smem>>
    %c11_55 = arith.constant 11 : index
    %89 = memref.load %arg1[%c11_55] : memref<16xi32, #tpu.memory_space<smem>>
    %90 = arith.index_cast %88 : i32 to index
    %c0_56 = arith.constant 0 : index
    %91 = vector.load %arg3[%90, %c0_56] : memref<100x32xf32, #tpu.memory_space<vmem>>, vector<1x32xf32>
    %92 = arith.index_cast %89 : i32 to index
    %c0_57 = arith.constant 0 : index
    %93 = vector.load %arg5[%92, %c0_57] : memref<2x32xf32, #tpu.memory_space<vmem>>, vector<1x32xf32>
    %94 = arith.addf %91, %93 : vector<1x32xf32>
    %c11_58 = arith.constant 11 : index
    %c0_59 = arith.constant 0 : index
    %95 = vector.load %arg14[%c11_58, %c0_59] : memref<16x32xf32, #tpu.memory_space<vmem>>, vector<1x32xf32>
    tpu.vector_store %arg14[%c11_58, %c0_59], %94 {strides = array<i32>} : memref<16x32xf32, #tpu.memory_space<vmem>>, vector<1x32xf32>,
    %c12 = arith.constant 12 : index
    %96 = memref.load %arg0[%c12] : memref<16xi32, #tpu.memory_space<smem>>
    %c12_60 = arith.constant 12 : index
    %97 = memref.load %arg1[%c12_60] : memref<16xi32, #tpu.memory_space<smem>>
    %98 = arith.index_cast %96 : i32 to index
    %c0_61 = arith.constant 0 : index
    %99 = vector.load %arg3[%98, %c0_61] : memref<100x32xf32, #tpu.memory_space<vmem>>, vector<1x32xf32>
    %100 = arith.index_cast %97 : i32 to index
    %c0_62 = arith.constant 0 : index
    %101 = vector.load %arg5[%100, %c0_62] : memref<2x32xf32, #tpu.memory_space<vmem>>, vector<1x32xf32>
    %102 = arith.addf %99, %101 : vector<1x32xf32>
    %c12_63 = arith.constant 12 : index
    %c0_64 = arith.constant 0 : index
    %103 = vector.load %arg14[%c12_63, %c0_64] : memref<16x32xf32, #tpu.memory_space<vmem>>, vector<1x32xf32>
    tpu.vector_store %arg14[%c12_63, %c0_64], %102 {strides = array<i32>} : memref<16x32xf32, #tpu.memory_space<vmem>>, vector<1x32xf32>,
    %c13 = arith.constant 13 : index
    %104 = memref.load %arg0[%c13] : memref<16xi32, #tpu.memory_space<smem>>
    %c13_65 = arith.constant 13 : index
    %105 = memref.load %arg1[%c13_65] : memref<16xi32, #tpu.memory_space<smem>>
    %106 = arith.index_cast %104 : i32 to index
    %c0_66 = arith.constant 0 : index
    %107 = vector.load %arg3[%106, %c0_66] : memref<100x32xf32, #tpu.memory_space<vmem>>, vector<1x32xf32>
    %108 = arith.index_cast %105 : i32 to index
    %c0_67 = arith.constant 0 : index
    %109 = vector.load %arg5[%108, %c0_67] : memref<2x32xf32, #tpu.memory_space<vmem>>, vector<1x32xf32>
    %110 = arith.addf %107, %109 : vector<1x32xf32>
    %c13_68 = arith.constant 13 : index
    %c0_69 = arith.constant 0 : index
    %111 = vector.load %arg14[%c13_68, %c0_69] : memref<16x32xf32, #tpu.memory_space<vmem>>, vector<1x32xf32>
    tpu.vector_store %arg14[%c13_68, %c0_69], %110 {strides = array<i32>} : memref<16x32xf32, #tpu.memory_space<vmem>>, vector<1x32xf32>,
    %c14 = arith.constant 14 : index
    %112 = memref.load %arg0[%c14] : memref<16xi32, #tpu.memory_space<smem>>
    %c14_70 = arith.constant 14 : index
    %113 = memref.load %arg1[%c14_70] : memref<16xi32, #tpu.memory_space<smem>>
    %114 = arith.index_cast %112 : i32 to index
    %c0_71 = arith.constant 0 : index
    %115 = vector.load %arg3[%114, %c0_71] : memref<100x32xf32, #tpu.memory_space<vmem>>, vector<1x32xf32>
    %116 = arith.index_cast %113 : i32 to index
    %c0_72 = arith.constant 0 : index
    %117 = vector.load %arg5[%116, %c0_72] : memref<2x32xf32, #tpu.memory_space<vmem>>, vector<1x32xf32>
    %118 = arith.addf %115, %117 : vector<1x32xf32>
    %c14_73 = arith.constant 14 : index
    %c0_74 = arith.constant 0 : index
    %119 = vector.load %arg14[%c14_73, %c0_74] : memref<16x32xf32, #tpu.memory_space<vmem>>, vector<1x32xf32>
    tpu.vector_store %arg14[%c14_73, %c0_74], %118 {strides = array<i32>} : memref<16x32xf32, #tpu.memory_space<vmem>>, vector<1x32xf32>,
    %c15 = arith.constant 15 : index
    %120 = memref.load %arg0[%c15] : memref<16xi32, #tpu.memory_space<smem>>
    %c15_75 = arith.constant 15 : index
    %121 = memref.load %arg1[%c15_75] : memref<16xi32, #tpu.memory_space<smem>>
    %122 = arith.index_cast %120 : i32 to index
    %c0_76 = arith.constant 0 : index
    %123 = vector.load %arg3[%122, %c0_76] : memref<100x32xf32, #tpu.memory_space<vmem>>, vector<1x32xf32>
    %124 = arith.index_cast %121 : i32 to index
    %c0_77 = arith.constant 0 : index
    %125 = vector.load %arg5[%124, %c0_77] : memref<2x32xf32, #tpu.memory_space<vmem>>, vector<1x32xf32>
    %126 = arith.addf %123, %125 : vector<1x32xf32>
    %c15_78 = arith.constant 15 : index
    %c0_79 = arith.constant 0 : index
    %127 = vector.load %arg14[%c15_78, %c0_79] : memref<16x32xf32, #tpu.memory_space<vmem>>, vector<1x32xf32>
    tpu.vector_store %arg14[%c15_78, %c0_79], %126 {strides = array<i32>} : memref<16x32xf32, #tpu.memory_space<vmem>>, vector<1x32xf32>,
    %c0_80 = arith.constant 0 : index
    %c0_81 = arith.constant 0 : index
    %128 = vector.load %arg4[%c0_80, %c0_81] : memref<8x32xf32, #tpu.memory_space<vmem>>, vector<8x32xf32>
    %129 = tpu.concatenate %128, %128 in 0 : vector<8x32xf32>, vector<8x32xf32> -> vector<16x32xf32>
    %c0_82 = arith.constant 0 : index
    %c0_83 = arith.constant 0 : index
    %130 = vector.load %arg14[%c0_82, %c0_83] : memref<16x32xf32, #tpu.memory_space<vmem>>, vector<16x32xf32>
    %131 = arith.addf %130, %129 : vector<16x32xf32>
    %c0_84 = arith.constant 0 : index
    %c0_85 = arith.constant 0 : index
    %132 = vector.load %arg6[%c0_84, %c0_85] : memref<2x32xf32, #tpu.memory_space<vmem>>, vector<1x32xf32>
    %c1_86 = arith.constant 1 : index
    %c0_87 = arith.constant 0 : index
    %133 = vector.load %arg6[%c1_86, %c0_87] : memref<2x32xf32, #tpu.memory_space<vmem>>, vector<1x32xf32>
    %cst = arith.constant dense<0.000000e+00> : vector<16xf32>
    %134 = vector.multi_reduction <add>, %131, %cst [1] : vector<16x32xf32> to vector<16xf32>
    %135 = vector.shape_cast %134 : vector<16xf32> to vector<16x1xf32>
    %cst_88 = arith.constant 3.200000e+01 : f32
    %136 = vector.broadcast %cst_88 : f32 to vector<16x1xf32>
    %137 = arith.divf %135, %136 : vector<16x1xf32>
    %138 = arith.mulf %131, %131 : vector<16x32xf32>
    %cst_89 = arith.constant dense<0.000000e+00> : vector<16xf32>
    %139 = vector.multi_reduction <add>, %138, %cst_89 [1] : vector<16x32xf32> to vector<16xf32>
    %140 = vector.shape_cast %139 : vector<16xf32> to vector<16x1xf32>
    %cst_90 = arith.constant 3.200000e+01 : f32
    %141 = vector.broadcast %cst_90 : f32 to vector<16x1xf32>
    %142 = arith.divf %140, %141 : vector<16x1xf32>
    %143 = arith.mulf %137, %137 : vector<16x1xf32>
    %144 = arith.subf %142, %143 : vector<16x1xf32>
    %145 = vector.broadcast %137 : vector<16x1xf32> to vector<16x32xf32>
    %146 = arith.subf %131, %145 : vector<16x32xf32>
    %cst_91 = arith.constant 9.99999996E-13 : f32
    %147 = vector.broadcast %cst_91 : f32 to vector<16x1xf32>
    %148 = arith.addf %144, %147 : vector<16x1xf32>
    %149 = math.rsqrt %148 : vector<16x1xf32>
    %150 = vector.broadcast %149 : vector<16x1xf32> to vector<16x32xf32>
    %151 = arith.mulf %146, %150 : vector<16x32xf32>
    %152 = vector.broadcast %132 : vector<1x32xf32> to vector<16x32xf32>
    %153 = arith.mulf %151, %152 : vector<16x32xf32>
    %154 = vector.broadcast %133 : vector<1x32xf32> to vector<16x32xf32>
    %155 = arith.addf %153, %154 : vector<16x32xf32>
    %c0_92 = arith.constant 0 : index
    %c0_93 = arith.constant 0 : index
    %c0_94 = arith.constant 0 : index
    %156 = vector.load %arg2[%c0_92, %c0_93, %c0_94] : memref<2x1x8xi32, #tpu.memory_space<vmem>>, vector<2x1x8xi32>
    %157 = arith.sitofp %156 : vector<2x1x8xi32> to vector<2x1x8xf32>
    %cst_95 = arith.constant 1.000000e+00 : f32
    %158 = vector.broadcast %cst_95 : f32 to vector<2x1x8xf32>
    %159 = arith.subf %158, %157 : vector<2x1x8xf32>
    %cst_96 = arith.constant -1.000000e+09 : f32
    %160 = vector.broadcast %cst_96 : f32 to vector<2x1x8xf32>
    %161 = arith.mulf %159, %160 : vector<2x1x8xf32>
    %162 = tpu.concatenate %161, %161 in 0 : vector<2x1x8xf32>, vector<2x1x8xf32> -> vector<4x1x8xf32>
    %c0_97 = arith.constant 0 : index
    %c0_98 = arith.constant 0 : index
    %c0_99 = arith.constant 0 : index
    %163 = vector.load %arg7[%c0_97, %c0_98, %c0_99] : memref<2x32x96xbf16, #tpu.memory_space<vmem>>, vector<1x32x96xbf16>
    %164 = vector.shape_cast %163 : vector<1x32x96xbf16> to vector<32x96xbf16>
    %c0_100 = arith.constant 0 : index
    %c0_101 = arith.constant 0 : index
    %c0_102 = arith.constant 0 : index
    %165 = vector.load %arg8[%c0_100, %c0_101, %c0_102] : memref<2x1x96xf32, #tpu.memory_space<vmem>>, vector<1x1x96xf32>
    %166 = vector.shape_cast %165 : vector<1x1x96xf32> to vector<1x96xf32>
    %c0_103 = arith.constant 0 : index
    %c0_104 = arith.constant 0 : index
    %c0_105 = arith.constant 0 : index
    %167 = vector.load %arg9[%c0_103, %c0_104, %c0_105] : memref<2x32x32xbf16, #tpu.memory_space<vmem>>, vector<1x32x32xbf16>
    %168 = vector.shape_cast %167 : vector<1x32x32xbf16> to vector<32x32xbf16>
    %c0_106 = arith.constant 0 : index
    %c0_107 = arith.constant 0 : index
    %c0_108 = arith.constant 0 : index
    %169 = vector.load %arg10[%c0_106, %c0_107, %c0_108] : memref<2x32x64xbf16, #tpu.memory_space<vmem>>, vector<1x32x64xbf16>
    %170 = vector.shape_cast %169 : vector<1x32x64xbf16> to vector<32x64xbf16>
    %c0_109 = arith.constant 0 : index
    %c0_110 = arith.constant 0 : index
    %c0_111 = arith.constant 0 : index
    %171 = vector.load %arg11[%c0_109, %c0_110, %c0_111] : memref<2x64x32xbf16, #tpu.memory_space<vmem>>, vector<1x64x32xbf16>
    %172 = vector.shape_cast %171 : vector<1x64x32xbf16> to vector<64x32xbf16>
    %c0_112 = arith.constant 0 : index
    %c0_113 = arith.constant 0 : index
    %c0_114 = arith.constant 0 : index
    %173 = vector.load %arg12[%c0_112, %c0_113, %c0_114] : memref<2x2x128xf32, #tpu.memory_space<vmem>>, vector<1x2x128xf32>
    %174 = vector.shape_cast %173 : vector<1x2x128xf32> to vector<2x128xf32>
    %175 = vector.extract_strided_slice %174 {offsets = [0, 0], sizes = [1, 32], strides = [1, 1]} : vector<2x128xf32> to vector<1x32xf32>
    %176 = vector.extract_strided_slice %174 {offsets = [0, 32], sizes = [1, 32], strides = [1, 1]} : vector<2x128xf32> to vector<1x32xf32>
    %177 = vector.extract_strided_slice %174 {offsets = [0, 64], sizes = [1, 32], strides = [1, 1]} : vector<2x128xf32> to vector<1x32xf32>
    %178 = vector.extract_strided_slice %174 {offsets = [0, 96], sizes = [1, 32], strides = [1, 1]} : vector<2x128xf32> to vector<1x32xf32>
    %179 = vector.extract_strided_slice %174 {offsets = [1, 0], sizes = [1, 32], strides = [1, 1]} : vector<2x128xf32> to vector<1x32xf32>
    %180 = vector.extract_strided_slice %174 {offsets = [1, 32], sizes = [1, 32], strides = [1, 1]} : vector<2x128xf32> to vector<1x32xf32>
    %181 = vector.extract_strided_slice %174 {offsets = [1, 64], sizes = [1, 64], strides = [1, 1]} : vector<2x128xf32> to vector<1x64xf32>
    %182 = arith.truncf %155 : vector<16x32xf32> to vector<16x32xbf16>
    %cst_115 = arith.constant dense<0.000000e+00> : vector<16x96xf32>
    %183 = tpu.matmul %182, %164, %cst_115 {dimension_numbers = #tpu.dot_dimension_numbers<[1], [0], [0], [1], [0, 0, 1, 1], [], []>} : vector<16x32xbf16>, vector<32x96xbf16>, vector<16x96xf32> -> vector<16x96xf32>
    %184 = vector.broadcast %166 : vector<1x96xf32> to vector<16x96xf32>
    %185 = arith.addf %183, %184 : vector<16x96xf32>
    %186 = vector.extract_strided_slice %185 {offsets = [0, 0], sizes = [8, 16], strides = [1, 1]} : vector<16x96xf32> to vector<8x16xf32>
    %187 = vector.extract_strided_slice %185 {offsets = [8, 0], sizes = [8, 16], strides = [1, 1]} : vector<16x96xf32> to vector<8x16xf32>
    %188 = vector.extract_strided_slice %185 {offsets = [0, 16], sizes = [8, 16], strides = [1, 1]} : vector<16x96xf32> to vector<8x16xf32>
    %189 = vector.extract_strided_slice %185 {offsets = [8, 16], sizes = [8, 16], strides = [1, 1]} : vector<16x96xf32> to vector<8x16xf32>
    %190 = vector.shape_cast %186 : vector<8x16xf32> to vector<1x8x16xf32>
    %191 = vector.shape_cast %187 : vector<8x16xf32> to vector<1x8x16xf32>
    %192 = vector.shape_cast %188 : vector<8x16xf32> to vector<1x8x16xf32>
    %193 = vector.shape_cast %189 : vector<8x16xf32> to vector<1x8x16xf32>
    %194 = tpu.concatenate %190, %191, %192, %193 in 0 : vector<1x8x16xf32>, vector<1x8x16xf32>, vector<1x8x16xf32>, vector<1x8x16xf32> -> vector<4x8x16xf32>
    %195 = arith.truncf %194 : vector<4x8x16xf32> to vector<4x8x16xbf16>
    %196 = vector.extract_strided_slice %185 {offsets = [0, 32], sizes = [8, 16], strides = [1, 1]} : vector<16x96xf32> to vector<8x16xf32>
    %197 = vector.extract_strided_slice %185 {offsets = [8, 32], sizes = [8, 16], strides = [1, 1]} : vector<16x96xf32> to vector<8x16xf32>
    %198 = vector.extract_strided_slice %185 {offsets = [0, 48], sizes = [8, 16], strides = [1, 1]} : vector<16x96xf32> to vector<8x16xf32>
    %199 = vector.extract_strided_slice %185 {offsets = [8, 48], sizes = [8, 16], strides = [1, 1]} : vector<16x96xf32> to vector<8x16xf32>
    %200 = vector.shape_cast %196 : vector<8x16xf32> to vector<1x8x16xf32>
    %201 = vector.shape_cast %197 : vector<8x16xf32> to vector<1x8x16xf32>
    %202 = vector.shape_cast %198 : vector<8x16xf32> to vector<1x8x16xf32>
    %203 = vector.shape_cast %199 : vector<8x16xf32> to vector<1x8x16xf32>
    %204 = tpu.concatenate %200, %201, %202, %203 in 0 : vector<1x8x16xf32>, vector<1x8x16xf32>, vector<1x8x16xf32>, vector<1x8x16xf32> -> vector<4x8x16xf32>
    %205 = arith.truncf %204 : vector<4x8x16xf32> to vector<4x8x16xbf16>
    %206 = vector.extract_strided_slice %185 {offsets = [0, 64], sizes = [8, 16], strides = [1, 1]} : vector<16x96xf32> to vector<8x16xf32>
    %207 = vector.extract_strided_slice %185 {offsets = [8, 64], sizes = [8, 16], strides = [1, 1]} : vector<16x96xf32> to vector<8x16xf32>
    %208 = vector.extract_strided_slice %185 {offsets = [0, 80], sizes = [8, 16], strides = [1, 1]} : vector<16x96xf32> to vector<8x16xf32>
    %209 = vector.extract_strided_slice %185 {offsets = [8, 80], sizes = [8, 16], strides = [1, 1]} : vector<16x96xf32> to vector<8x16xf32>
    %210 = vector.shape_cast %206 : vector<8x16xf32> to vector<1x8x16xf32>
    %211 = vector.shape_cast %207 : vector<8x16xf32> to vector<1x8x16xf32>
    %212 = vector.shape_cast %208 : vector<8x16xf32> to vector<1x8x16xf32>
    %213 = vector.shape_cast %209 : vector<8x16xf32> to vector<1x8x16xf32>
    %214 = tpu.concatenate %210, %211, %212, %213 in 0 : vector<1x8x16xf32>, vector<1x8x16xf32>, vector<1x8x16xf32>, vector<1x8x16xf32> -> vector<4x8x16xf32>
    %215 = arith.truncf %214 : vector<4x8x16xf32> to vector<4x8x16xbf16>
    "tpu.trace_start"() <{level = 10 : i32, message = "bqd,bkd->bqk"}> : () -> ()
    %cst_116 = arith.constant dense<0.000000e+00> : vector<4x8x8xf32>
    %216 = tpu.matmul %195, %205, %cst_116 {dimension_numbers = #tpu.dot_dimension_numbers<[2], [2], [1], [1], [0, 0, 0, 1, 1, 1], [0], [0]>} : vector<4x8x16xbf16>, vector<4x8x16xbf16>, vector<4x8x8xf32> -> vector<4x8x8xf32>
    "tpu.trace_stop"() : () -> ()
    %217 = vector.broadcast %162 : vector<4x1x8xf32> to vector<4x8x8xf32>
    %218 = arith.addf %216, %217 : vector<4x8x8xf32>
    %cst_117 = arith.constant dense<0xFF800000> : vector<4x8xf32>
    %219 = vector.multi_reduction <maximumf>, %218, %cst_117 [2] : vector<4x8x8xf32> to vector<4x8xf32>
    %220 = vector.shape_cast %219 : vector<4x8xf32> to vector<4x8x1xf32>
    %221 = vector.broadcast %220 : vector<4x8x1xf32> to vector<4x8x8xf32>
    %222 = arith.subf %218, %221 : vector<4x8x8xf32>
    %223 = math.exp %222 : vector<4x8x8xf32>
    %cst_118 = arith.constant dense<0.000000e+00> : vector<4x8xf32>
    %224 = vector.multi_reduction <add>, %223, %cst_118 [2] : vector<4x8x8xf32> to vector<4x8xf32>
    %225 = vector.shape_cast %224 : vector<4x8xf32> to vector<4x8x1xf32>
    %226 = tpu.reciprocal %225 {approx = true} : vector<4x8x1xf32> -> vector<4x8x1xf32>
    %227 = vector.broadcast %226 : vector<4x8x1xf32> to vector<4x8x8xf32>
    %228 = arith.mulf %223, %227 : vector<4x8x8xf32>
    %229 = arith.truncf %228 : vector<4x8x8xf32> to vector<4x8x8xbf16>
    "tpu.trace_start"() <{level = 10 : i32, message = "bqk,bkd->bqd"}> : () -> ()
    %cst_119 = arith.constant dense<0.000000e+00> : vector<4x8x16xf32>
    %230 = tpu.matmul %229, %215, %cst_119 {dimension_numbers = #tpu.dot_dimension_numbers<[2], [1], [1], [2], [0, 0, 0, 1, 1, 2], [0], [0]>} : vector<4x8x8xbf16>, vector<4x8x16xbf16>, vector<4x8x16xf32> -> vector<4x8x16xf32>
    "tpu.trace_stop"() : () -> ()
    %231 = vector.extract_strided_slice %230 {offsets = [0, 0, 0], sizes = [1, 8, 16], strides = [1, 1, 1]} : vector<4x8x16xf32> to vector<1x8x16xf32>
    %232 = vector.shape_cast %231 : vector<1x8x16xf32> to vector<8x16xf32>
    %233 = vector.extract_strided_slice %230 {offsets = [2, 0, 0], sizes = [1, 8, 16], strides = [1, 1, 1]} : vector<4x8x16xf32> to vector<1x8x16xf32>
    %234 = vector.shape_cast %233 : vector<1x8x16xf32> to vector<8x16xf32>
    %235 = tpu.concatenate %232, %234 in 1 : vector<8x16xf32>, vector<8x16xf32> -> vector<8x32xf32>
    %236 = vector.extract_strided_slice %230 {offsets = [1, 0, 0], sizes = [1, 8, 16], strides = [1, 1, 1]} : vector<4x8x16xf32> to vector<1x8x16xf32>
    %237 = vector.shape_cast %236 : vector<1x8x16xf32> to vector<8x16xf32>
    %238 = vector.extract_strided_slice %230 {offsets = [3, 0, 0], sizes = [1, 8, 16], strides = [1, 1, 1]} : vector<4x8x16xf32> to vector<1x8x16xf32>
    %239 = vector.shape_cast %238 : vector<1x8x16xf32> to vector<8x16xf32>
    %240 = tpu.concatenate %237, %239 in 1 : vector<8x16xf32>, vector<8x16xf32> -> vector<8x32xf32>
    %241 = tpu.concatenate %235, %240 in 0 : vector<8x32xf32>, vector<8x32xf32> -> vector<16x32xf32>
    %242 = arith.truncf %241 : vector<16x32xf32> to vector<16x32xbf16>
    %cst_120 = arith.constant dense<0.000000e+00> : vector<16x32xf32>
    %243 = tpu.matmul %242, %168, %cst_120 {dimension_numbers = #tpu.dot_dimension_numbers<[1], [0], [0], [1], [0, 0, 1, 1], [], []>} : vector<16x32xbf16>, vector<32x32xbf16>, vector<16x32xf32> -> vector<16x32xf32>
    %244 = vector.broadcast %175 : vector<1x32xf32> to vector<16x32xf32>
    %245 = arith.addf %243, %244 : vector<16x32xf32>
    %246 = arith.addf %155, %245 : vector<16x32xf32>
    %cst_121 = arith.constant dense<0.000000e+00> : vector<16xf32>
    %247 = vector.multi_reduction <add>, %246, %cst_121 [1] : vector<16x32xf32> to vector<16xf32>
    %248 = vector.shape_cast %247 : vector<16xf32> to vector<16x1xf32>
    %cst_122 = arith.constant 3.200000e+01 : f32
    %249 = vector.broadcast %cst_122 : f32 to vector<16x1xf32>
    %250 = arith.divf %248, %249 : vector<16x1xf32>
    %251 = arith.mulf %246, %246 : vector<16x32xf32>
    %cst_123 = arith.constant dense<0.000000e+00> : vector<16xf32>
    %252 = vector.multi_reduction <add>, %251, %cst_123 [1] : vector<16x32xf32> to vector<16xf32>
    %253 = vector.shape_cast %252 : vector<16xf32> to vector<16x1xf32>
    %cst_124 = arith.constant 3.200000e+01 : f32
    %254 = vector.broadcast %cst_124 : f32 to vector<16x1xf32>
    %255 = arith.divf %253, %254 : vector<16x1xf32>
    %256 = arith.mulf %250, %250 : vector<16x1xf32>
    %257 = arith.subf %255, %256 : vector<16x1xf32>
    %258 = vector.broadcast %250 : vector<16x1xf32> to vector<16x32xf32>
    %259 = arith.subf %246, %258 : vector<16x32xf32>
    %cst_125 = arith.constant 9.99999996E-13 : f32
    %260 = vector.broadcast %cst_125 : f32 to vector<16x1xf32>
    %261 = arith.addf %257, %260 : vector<16x1xf32>
    %262 = math.rsqrt %261 : vector<16x1xf32>
    %263 = vector.broadcast %262 : vector<16x1xf32> to vector<16x32xf32>
    %264 = arith.mulf %259, %263 : vector<16x32xf32>
    %265 = vector.broadcast %176 : vector<1x32xf32> to vector<16x32xf32>
    %266 = arith.mulf %264, %265 : vector<16x32xf32>
    %267 = vector.broadcast %177 : vector<1x32xf32> to vector<16x32xf32>
    %268 = arith.addf %266, %267 : vector<16x32xf32>
    %269 = arith.truncf %268 : vector<16x32xf32> to vector<16x32xbf16>
    %cst_126 = arith.constant dense<0.000000e+00> : vector<16x64xf32>
    %270 = tpu.matmul %269, %170, %cst_126 {dimension_numbers = #tpu.dot_dimension_numbers<[1], [0], [0], [1], [0, 0, 1, 1], [], []>} : vector<16x32xbf16>, vector<32x64xbf16>, vector<16x64xf32> -> vector<16x64xf32>
    %271 = vector.broadcast %181 : vector<1x64xf32> to vector<16x64xf32>
    %272 = arith.addf %270, %271 : vector<16x64xf32>
    %cst_127 = arith.constant 5.000000e-01 : f32
    %273 = vector.broadcast %cst_127 : f32 to vector<16x64xf32>
    %274 = arith.mulf %273, %272 : vector<16x64xf32>
    %cst_128 = arith.constant 4.471500e-02 : f32
    %275 = vector.broadcast %cst_128 : f32 to vector<16x64xf32>
    %276 = arith.mulf %275, %272 : vector<16x64xf32>
    %277 = arith.mulf %276, %272 : vector<16x64xf32>
    %278 = arith.mulf %277, %272 : vector<16x64xf32>
    %279 = arith.addf %272, %278 : vector<16x64xf32>
    %cst_129 = arith.constant 0.797884583 : f32
    %280 = vector.broadcast %cst_129 : f32 to vector<16x64xf32>
    %281 = arith.mulf %280, %279 : vector<16x64xf32>
    %282 = math.tanh %281 : vector<16x64xf32>
    %cst_130 = arith.constant 1.000000e+00 : f32
    %283 = vector.broadcast %cst_130 : f32 to vector<16x64xf32>
    %284 = arith.addf %283, %282 : vector<16x64xf32>
    %285 = arith.mulf %274, %284 : vector<16x64xf32>
    %286 = arith.truncf %285 : vector<16x64xf32> to vector<16x64xbf16>
    %cst_131 = arith.constant dense<0.000000e+00> : vector<16x32xf32>
    %287 = tpu.matmul %286, %172, %cst_131 {dimension_numbers = #tpu.dot_dimension_numbers<[1], [0], [0], [1], [0, 0, 1, 1], [], []>} : vector<16x64xbf16>, vector<64x32xbf16>, vector<16x32xf32> -> vector<16x32xf32>
    %288 = vector.broadcast %178 : vector<1x32xf32> to vector<16x32xf32>
    %289 = arith.addf %287, %288 : vector<16x32xf32>
    %290 = arith.addf %268, %289 : vector<16x32xf32>
    %cst_132 = arith.constant dense<0.000000e+00> : vector<16xf32>
    %291 = vector.multi_reduction <add>, %290, %cst_132 [1] : vector<16x32xf32> to vector<16xf32>
    %292 = vector.shape_cast %291 : vector<16xf32> to vector<16x1xf32>
    %cst_133 = arith.constant 3.200000e+01 : f32
    %293 = vector.broadcast %cst_133 : f32 to vector<16x1xf32>
    %294 = arith.divf %292, %293 : vector<16x1xf32>
    %295 = arith.mulf %290, %290 : vector<16x32xf32>
    %cst_134 = arith.constant dense<0.000000e+00> : vector<16xf32>
    %296 = vector.multi_reduction <add>, %295, %cst_134 [1] : vector<16x32xf32> to vector<16xf32>
    %297 = vector.shape_cast %296 : vector<16xf32> to vector<16x1xf32>
    %cst_135 = arith.constant 3.200000e+01 : f32
    %298 = vector.broadcast %cst_135 : f32 to vector<16x1xf32>
    %299 = arith.divf %297, %298 : vector<16x1xf32>
    %300 = arith.mulf %294, %294 : vector<16x1xf32>
    %301 = arith.subf %299, %300 : vector<16x1xf32>
    %302 = vector.broadcast %294 : vector<16x1xf32> to vector<16x32xf32>
    %303 = arith.subf %290, %302 : vector<16x32xf32>
    %cst_136 = arith.constant 9.99999996E-13 : f32
    %304 = vector.broadcast %cst_136 : f32 to vector<16x1xf32>
    %305 = arith.addf %301, %304 : vector<16x1xf32>
    %306 = math.rsqrt %305 : vector<16x1xf32>
    %307 = vector.broadcast %306 : vector<16x1xf32> to vector<16x32xf32>
    %308 = arith.mulf %303, %307 : vector<16x32xf32>
    %309 = vector.broadcast %179 : vector<1x32xf32> to vector<16x32xf32>
    %310 = arith.mulf %308, %309 : vector<16x32xf32>
    %311 = vector.broadcast %180 : vector<1x32xf32> to vector<16x32xf32>
    %312 = arith.addf %310, %311 : vector<16x32xf32>
    %c1_137 = arith.constant 1 : index
    %c0_138 = arith.constant 0 : index
    %c0_139 = arith.constant 0 : index
    %313 = vector.load %arg7[%c1_137, %c0_138, %c0_139] : memref<2x32x96xbf16, #tpu.memory_space<vmem>>, vector<1x32x96xbf16>
    %314 = vector.shape_cast %313 : vector<1x32x96xbf16> to vector<32x96xbf16>
    %c1_140 = arith.constant 1 : index
    %c0_141 = arith.constant 0 : index
    %c0_142 = arith.constant 0 : index
    %315 = vector.load %arg8[%c1_140, %c0_141, %c0_142] : memref<2x1x96xf32, #tpu.memory_space<vmem>>, vector<1x1x96xf32>
    %316 = vector.shape_cast %315 : vector<1x1x96xf32> to vector<1x96xf32>
    %c1_143 = arith.constant 1 : index
    %c0_144 = arith.constant 0 : index
    %c0_145 = arith.constant 0 : index
    %317 = vector.load %arg9[%c1_143, %c0_144, %c0_145] : memref<2x32x32xbf16, #tpu.memory_space<vmem>>, vector<1x32x32xbf16>
    %318 = vector.shape_cast %317 : vector<1x32x32xbf16> to vector<32x32xbf16>
    %c1_146 = arith.constant 1 : index
    %c0_147 = arith.constant 0 : index
    %c0_148 = arith.constant 0 : index
    %319 = vector.load %arg10[%c1_146, %c0_147, %c0_148] : memref<2x32x64xbf16, #tpu.memory_space<vmem>>, vector<1x32x64xbf16>
    %320 = vector.shape_cast %319 : vector<1x32x64xbf16> to vector<32x64xbf16>
    %c1_149 = arith.constant 1 : index
    %c0_150 = arith.constant 0 : index
    %c0_151 = arith.constant 0 : index
    %321 = vector.load %arg11[%c1_149, %c0_150, %c0_151] : memref<2x64x32xbf16, #tpu.memory_space<vmem>>, vector<1x64x32xbf16>
    %322 = vector.shape_cast %321 : vector<1x64x32xbf16> to vector<64x32xbf16>
    %c1_152 = arith.constant 1 : index
    %c0_153 = arith.constant 0 : index
    %c0_154 = arith.constant 0 : index
    %323 = vector.load %arg12[%c1_152, %c0_153, %c0_154] : memref<2x2x128xf32, #tpu.memory_space<vmem>>, vector<1x2x128xf32>
    %324 = vector.shape_cast %323 : vector<1x2x128xf32> to vector<2x128xf32>
    %325 = vector.extract_strided_slice %324 {offsets = [0, 0], sizes = [1, 32], strides = [1, 1]} : vector<2x128xf32> to vector<1x32xf32>
    %326 = vector.extract_strided_slice %324 {offsets = [0, 32], sizes = [1, 32], strides = [1, 1]} : vector<2x128xf32> to vector<1x32xf32>
    %327 = vector.extract_strided_slice %324 {offsets = [0, 64], sizes = [1, 32], strides = [1, 1]} : vector<2x128xf32> to vector<1x32xf32>
    %328 = vector.extract_strided_slice %324 {offsets = [0, 96], sizes = [1, 32], strides = [1, 1]} : vector<2x128xf32> to vector<1x32xf32>
    %329 = vector.extract_strided_slice %324 {offsets = [1, 0], sizes = [1, 32], strides = [1, 1]} : vector<2x128xf32> to vector<1x32xf32>
    %330 = vector.extract_strided_slice %324 {offsets = [1, 32], sizes = [1, 32], strides = [1, 1]} : vector<2x128xf32> to vector<1x32xf32>
    %331 = vector.extract_strided_slice %324 {offsets = [1, 64], sizes = [1, 64], strides = [1, 1]} : vector<2x128xf32> to vector<1x64xf32>
    %332 = arith.truncf %312 : vector<16x32xf32> to vector<16x32xbf16>
    %cst_155 = arith.constant dense<0.000000e+00> : vector<16x96xf32>
    %333 = tpu.matmul %332, %314, %cst_155 {dimension_numbers = #tpu.dot_dimension_numbers<[1], [0], [0], [1], [0, 0, 1, 1], [], []>} : vector<16x32xbf16>, vector<32x96xbf16>, vector<16x96xf32> -> vector<16x96xf32>
    %334 = vector.broadcast %316 : vector<1x96xf32> to vector<16x96xf32>
    %335 = arith.addf %333, %334 : vector<16x96xf32>
    %336 = vector.extract_strided_slice %335 {offsets = [0, 0], sizes = [8, 16], strides = [1, 1]} : vector<16x96xf32> to vector<8x16xf32>
    %337 = vector.extract_strided_slice %335 {offsets = [8, 0], sizes = [8, 16], strides = [1, 1]} : vector<16x96xf32> to vector<8x16xf32>
    %338 = vector.extract_strided_slice %335 {offsets = [0, 16], sizes = [8, 16], strides = [1, 1]} : vector<16x96xf32> to vector<8x16xf32>
    %339 = vector.extract_strided_slice %335 {offsets = [8, 16], sizes = [8, 16], strides = [1, 1]} : vector<16x96xf32> to vector<8x16xf32>
    %340 = vector.shape_cast %336 : vector<8x16xf32> to vector<1x8x16xf32>
    %341 = vector.shape_cast %337 : vector<8x16xf32> to vector<1x8x16xf32>
    %342 = vector.shape_cast %338 : vector<8x16xf32> to vector<1x8x16xf32>
    %343 = vector.shape_cast %339 : vector<8x16xf32> to vector<1x8x16xf32>
    %344 = tpu.concatenate %340, %341, %342, %343 in 0 : vector<1x8x16xf32>, vector<1x8x16xf32>, vector<1x8x16xf32>, vector<1x8x16xf32> -> vector<4x8x16xf32>
    %345 = arith.truncf %344 : vector<4x8x16xf32> to vector<4x8x16xbf16>
    %346 = vector.extract_strided_slice %335 {offsets = [0, 32], sizes = [8, 16], strides = [1, 1]} : vector<16x96xf32> to vector<8x16xf32>
    %347 = vector.extract_strided_slice %335 {offsets = [8, 32], sizes = [8, 16], strides = [1, 1]} : vector<16x96xf32> to vector<8x16xf32>
    %348 = vector.extract_strided_slice %335 {offsets = [0, 48], sizes = [8, 16], strides = [1, 1]} : vector<16x96xf32> to vector<8x16xf32>
    %349 = vector.extract_strided_slice %335 {offsets = [8, 48], sizes = [8, 16], strides = [1, 1]} : vector<16x96xf32> to vector<8x16xf32>
    %350 = vector.shape_cast %346 : vector<8x16xf32> to vector<1x8x16xf32>
    %351 = vector.shape_cast %347 : vector<8x16xf32> to vector<1x8x16xf32>
    %352 = vector.shape_cast %348 : vector<8x16xf32> to vector<1x8x16xf32>
    %353 = vector.shape_cast %349 : vector<8x16xf32> to vector<1x8x16xf32>
    %354 = tpu.concatenate %350, %351, %352, %353 in 0 : vector<1x8x16xf32>, vector<1x8x16xf32>, vector<1x8x16xf32>, vector<1x8x16xf32> -> vector<4x8x16xf32>
    %355 = arith.truncf %354 : vector<4x8x16xf32> to vector<4x8x16xbf16>
    %356 = vector.extract_strided_slice %335 {offsets = [0, 64], sizes = [8, 16], strides = [1, 1]} : vector<16x96xf32> to vector<8x16xf32>
    %357 = vector.extract_strided_slice %335 {offsets = [8, 64], sizes = [8, 16], strides = [1, 1]} : vector<16x96xf32> to vector<8x16xf32>
    %358 = vector.extract_strided_slice %335 {offsets = [0, 80], sizes = [8, 16], strides = [1, 1]} : vector<16x96xf32> to vector<8x16xf32>
    %359 = vector.extract_strided_slice %335 {offsets = [8, 80], sizes = [8, 16], strides = [1, 1]} : vector<16x96xf32> to vector<8x16xf32>
    %360 = vector.shape_cast %356 : vector<8x16xf32> to vector<1x8x16xf32>
    %361 = vector.shape_cast %357 : vector<8x16xf32> to vector<1x8x16xf32>
    %362 = vector.shape_cast %358 : vector<8x16xf32> to vector<1x8x16xf32>
    %363 = vector.shape_cast %359 : vector<8x16xf32> to vector<1x8x16xf32>
    %364 = tpu.concatenate %360, %361, %362, %363 in 0 : vector<1x8x16xf32>, vector<1x8x16xf32>, vector<1x8x16xf32>, vector<1x8x16xf32> -> vector<4x8x16xf32>
    %365 = arith.truncf %364 : vector<4x8x16xf32> to vector<4x8x16xbf16>
    "tpu.trace_start"() <{level = 10 : i32, message = "bqd,bkd->bqk"}> : () -> ()
    %cst_156 = arith.constant dense<0.000000e+00> : vector<4x8x8xf32>
    %366 = tpu.matmul %345, %355, %cst_156 {dimension_numbers = #tpu.dot_dimension_numbers<[2], [2], [1], [1], [0, 0, 0, 1, 1, 1], [0], [0]>} : vector<4x8x16xbf16>, vector<4x8x16xbf16>, vector<4x8x8xf32> -> vector<4x8x8xf32>
    "tpu.trace_stop"() : () -> ()
    %367 = vector.broadcast %162 : vector<4x1x8xf32> to vector<4x8x8xf32>
    %368 = arith.addf %366, %367 : vector<4x8x8xf32>
    %cst_157 = arith.constant dense<0xFF800000> : vector<4x8xf32>
    %369 = vector.multi_reduction <maximumf>, %368, %cst_157 [2] : vector<4x8x8xf32> to vector<4x8xf32>
    %370 = vector.shape_cast %369 : vector<4x8xf32> to vector<4x8x1xf32>
    %371 = vector.broadcast %370 : vector<4x8x1xf32> to vector<4x8x8xf32>
    %372 = arith.subf %368, %371 : vector<4x8x8xf32>
    %373 = math.exp %372 : vector<4x8x8xf32>
    %cst_158 = arith.constant dense<0.000000e+00> : vector<4x8xf32>
    %374 = vector.multi_reduction <add>, %373, %cst_158 [2] : vector<4x8x8xf32> to vector<4x8xf32>
    %375 = vector.shape_cast %374 : vector<4x8xf32> to vector<4x8x1xf32>
    %376 = tpu.reciprocal %375 {approx = true} : vector<4x8x1xf32> -> vector<4x8x1xf32>
    %377 = vector.broadcast %376 : vector<4x8x1xf32> to vector<4x8x8xf32>
    %378 = arith.mulf %373, %377 : vector<4x8x8xf32>
    %379 = arith.truncf %378 : vector<4x8x8xf32> to vector<4x8x8xbf16>
    "tpu.trace_start"() <{level = 10 : i32, message = "bqk,bkd->bqd"}> : () -> ()
    %cst_159 = arith.constant dense<0.000000e+00> : vector<4x8x16xf32>
    %380 = tpu.matmul %379, %365, %cst_159 {dimension_numbers = #tpu.dot_dimension_numbers<[2], [1], [1], [2], [0, 0, 0, 1, 1, 2], [0], [0]>} : vector<4x8x8xbf16>, vector<4x8x16xbf16>, vector<4x8x16xf32> -> vector<4x8x16xf32>
    "tpu.trace_stop"() : () -> ()
    %381 = vector.extract_strided_slice %380 {offsets = [0, 0, 0], sizes = [1, 8, 16], strides = [1, 1, 1]} : vector<4x8x16xf32> to vector<1x8x16xf32>
    %382 = vector.shape_cast %381 : vector<1x8x16xf32> to vector<8x16xf32>
    %383 = vector.extract_strided_slice %380 {offsets = [2, 0, 0], sizes = [1, 8, 16], strides = [1, 1, 1]} : vector<4x8x16xf32> to vector<1x8x16xf32>
    %384 = vector.shape_cast %383 : vector<1x8x16xf32> to vector<8x16xf32>
    %385 = tpu.concatenate %382, %384 in 1 : vector<8x16xf32>, vector<8x16xf32> -> vector<8x32xf32>
    %386 = vector.extract_strided_slice %380 {offsets = [1, 0, 0], sizes = [1, 8, 16], strides = [1, 1, 1]} : vector<4x8x16xf32> to vector<1x8x16xf32>
    %387 = vector.shape_cast %386 : vector<1x8x16xf32> to vector<8x16xf32>
    %388 = vector.extract_strided_slice %380 {offsets = [3, 0, 0], sizes = [1, 8, 16], strides = [1, 1, 1]} : vector<4x8x16xf32> to vector<1x8x16xf32>
    %389 = vector.shape_cast %388 : vector<1x8x16xf32> to vector<8x16xf32>
    %390 = tpu.concatenate %387, %389 in 1 : vector<8x16xf32>, vector<8x16xf32> -> vector<8x32xf32>
    %391 = tpu.concatenate %385, %390 in 0 : vector<8x32xf32>, vector<8x32xf32> -> vector<16x32xf32>
    %392 = arith.truncf %391 : vector<16x32xf32> to vector<16x32xbf16>
    %cst_160 = arith.constant dense<0.000000e+00> : vector<16x32xf32>
    %393 = tpu.matmul %392, %318, %cst_160 {dimension_numbers = #tpu.dot_dimension_numbers<[1], [0], [0], [1], [0, 0, 1, 1], [], []>} : vector<16x32xbf16>, vector<32x32xbf16>, vector<16x32xf32> -> vector<16x32xf32>
    %394 = vector.broadcast %325 : vector<1x32xf32> to vector<16x32xf32>
    %395 = arith.addf %393, %394 : vector<16x32xf32>
    %396 = arith.addf %312, %395 : vector<16x32xf32>
    %cst_161 = arith.constant dense<0.000000e+00> : vector<16xf32>
    %397 = vector.multi_reduction <add>, %396, %cst_161 [1] : vector<16x32xf32> to vector<16xf32>
    %398 = vector.shape_cast %397 : vector<16xf32> to vector<16x1xf32>
    %cst_162 = arith.constant 3.200000e+01 : f32
    %399 = vector.broadcast %cst_162 : f32 to vector<16x1xf32>
    %400 = arith.divf %398, %399 : vector<16x1xf32>
    %401 = arith.mulf %396, %396 : vector<16x32xf32>
    %cst_163 = arith.constant dense<0.000000e+00> : vector<16xf32>
    %402 = vector.multi_reduction <add>, %401, %cst_163 [1] : vector<16x32xf32> to vector<16xf32>
    %403 = vector.shape_cast %402 : vector<16xf32> to vector<16x1xf32>
    %cst_164 = arith.constant 3.200000e+01 : f32
    %404 = vector.broadcast %cst_164 : f32 to vector<16x1xf32>
    %405 = arith.divf %403, %404 : vector<16x1xf32>
    %406 = arith.mulf %400, %400 : vector<16x1xf32>
    %407 = arith.subf %405, %406 : vector<16x1xf32>
    %408 = vector.broadcast %400 : vector<16x1xf32> to vector<16x32xf32>
    %409 = arith.subf %396, %408 : vector<16x32xf32>
    %cst_165 = arith.constant 9.99999996E-13 : f32
    %410 = vector.broadcast %cst_165 : f32 to vector<16x1xf32>
    %411 = arith.addf %407, %410 : vector<16x1xf32>
    %412 = math.rsqrt %411 : vector<16x1xf32>
    %413 = vector.broadcast %412 : vector<16x1xf32> to vector<16x32xf32>
    %414 = arith.mulf %409, %413 : vector<16x32xf32>
    %415 = vector.broadcast %326 : vector<1x32xf32> to vector<16x32xf32>
    %416 = arith.mulf %414, %415 : vector<16x32xf32>
    %417 = vector.broadcast %327 : vector<1x32xf32> to vector<16x32xf32>
    %418 = arith.addf %416, %417 : vector<16x32xf32>
    %419 = arith.truncf %418 : vector<16x32xf32> to vector<16x32xbf16>
    %cst_166 = arith.constant dense<0.000000e+00> : vector<16x64xf32>
    %420 = tpu.matmul %419, %320, %cst_166 {dimension_numbers = #tpu.dot_dimension_numbers<[1], [0], [0], [1], [0, 0, 1, 1], [], []>} : vector<16x32xbf16>, vector<32x64xbf16>, vector<16x64xf32> -> vector<16x64xf32>
    %421 = vector.broadcast %331 : vector<1x64xf32> to vector<16x64xf32>
    %422 = arith.addf %420, %421 : vector<16x64xf32>
    %cst_167 = arith.constant 5.000000e-01 : f32
    %423 = vector.broadcast %cst_167 : f32 to vector<16x64xf32>
    %424 = arith.mulf %423, %422 : vector<16x64xf32>
    %cst_168 = arith.constant 4.471500e-02 : f32
    %425 = vector.broadcast %cst_168 : f32 to vector<16x64xf32>
    %426 = arith.mulf %425, %422 : vector<16x64xf32>
    %427 = arith.mulf %426, %422 : vector<16x64xf32>
    %428 = arith.mulf %427, %422 : vector<16x64xf32>
    %429 = arith.addf %422, %428 : vector<16x64xf32>
    %cst_169 = arith.constant 0.797884583 : f32
    %430 = vector.broadcast %cst_169 : f32 to vector<16x64xf32>
    %431 = arith.mulf %430, %429 : vector<16x64xf32>
    %432 = math.tanh %431 : vector<16x64xf32>
    %cst_170 = arith.constant 1.000000e+00 : f32
    %433 = vector.broadcast %cst_170 : f32 to vector<16x64xf32>
    %434 = arith.addf %433, %432 : vector<16x64xf32>
    %435 = arith.mulf %424, %434 : vector<16x64xf32>
    %436 = arith.truncf %435 : vector<16x64xf32> to vector<16x64xbf16>
    %cst_171 = arith.constant dense<0.000000e+00> : vector<16x32xf32>
    %437 = tpu.matmul %436, %322, %cst_171 {dimension_numbers = #tpu.dot_dimension_numbers<[1], [0], [0], [1], [0, 0, 1, 1], [], []>} : vector<16x64xbf16>, vector<64x32xbf16>, vector<16x32xf32> -> vector<16x32xf32>
    %438 = vector.broadcast %328 : vector<1x32xf32> to vector<16x32xf32>
    %439 = arith.addf %437, %438 : vector<16x32xf32>
    %440 = arith.addf %418, %439 : vector<16x32xf32>
    %cst_172 = arith.constant dense<0.000000e+00> : vector<16xf32>
    %441 = vector.multi_reduction <add>, %440, %cst_172 [1] : vector<16x32xf32> to vector<16xf32>
    %442 = vector.shape_cast %441 : vector<16xf32> to vector<16x1xf32>
    %cst_173 = arith.constant 3.200000e+01 : f32
    %443 = vector.broadcast %cst_173 : f32 to vector<16x1xf32>
    %444 = arith.divf %442, %443 : vector<16x1xf32>
    %445 = arith.mulf %440, %440 : vector<16x32xf32>
    %cst_174 = arith.constant dense<0.000000e+00> : vector<16xf32>
    %446 = vector.multi_reduction <add>, %445, %cst_174 [1] : vector<16x32xf32> to vector<16xf32>
    %447 = vector.shape_cast %446 : vector<16xf32> to vector<16x1xf32>
    %cst_175 = arith.constant 3.200000e+01 : f32
    %448 = vector.broadcast %cst_175 : f32 to vector<16x1xf32>
    %449 = arith.divf %447, %448 : vector<16x1xf32>
    %450 = arith.mulf %444, %444 : vector<16x1xf32>
    %451 = arith.subf %449, %450 : vector<16x1xf32>
    %452 = vector.broadcast %444 : vector<16x1xf32> to vector<16x32xf32>
    %453 = arith.subf %440, %452 : vector<16x32xf32>
    %cst_176 = arith.constant 9.99999996E-13 : f32
    %454 = vector.broadcast %cst_176 : f32 to vector<16x1xf32>
    %455 = arith.addf %451, %454 : vector<16x1xf32>
    %456 = math.rsqrt %455 : vector<16x1xf32>
    %457 = vector.broadcast %456 : vector<16x1xf32> to vector<16x32xf32>
    %458 = arith.mulf %453, %457 : vector<16x32xf32>
    %459 = vector.broadcast %329 : vector<1x32xf32> to vector<16x32xf32>
    %460 = arith.mulf %458, %459 : vector<16x32xf32>
    %461 = vector.broadcast %330 : vector<1x32xf32> to vector<16x32xf32>
    %462 = arith.addf %460, %461 : vector<16x32xf32>
    %c0_177 = arith.constant 0 : index
    %c0_178 = arith.constant 0 : index
    %463 = vector.load %arg13[%c0_177, %c0_178] : memref<16x32xf32, #tpu.memory_space<vmem>>, vector<16x32xf32>
    tpu.vector_store %arg13[%c0_177, %c0_178], %462 {strides = array<i32>} : memref<16x32xf32, #tpu.memory_space<vmem>>, vector<16x32xf32>,
    return
  }
}

</mosaic_0001>

<bundles_post_ra>
// kernel: transformer_forward.1
= control target key start
LH: loop header
LB: loop body
LE: loop exit
PB: predicated region body
PF: predicated region fallthrough
CT: control target
= control target key end

     0   :  { %s3069_s0 = inlined_call_operand.vmem [shape: s32[16], index: 0, kind: input, shape index: {}]   ;;  %s3070_s1 = inlined_call_operand.vmem [shape: s32[16], index: 1, kind: input, shape index: {}]   ;;  %s3071_s2 = inlined_call_operand.vmem [shape: s32[2,1,8], index: 2, kind: input, shape index: {}]   ;;  %s3072_s3 = inlined_call_operand.vmem [shape: f32[100,32], index: 3, kind: input, shape index: {}]   ;;  %s3073_s4 = inlined_call_operand.vmem [shape: f32[8,32], index: 4, kind: input, shape index: {}]   ;;  %s3074_s5 = inlined_call_operand.vmem [shape: f32[2,32], index: 5, kind: input, shape index: {}]   ;;  %s3075_s6 = inlined_call_operand.vmem [shape: f32[2,32], index: 6, kind: input, shape index: {}]   ;;  %s3076_s7 = inlined_call_operand.vmem [shape: bf16[2,32,96], index: 7, kind: input, shape index: {}]   ;;  %s3077_s8 = inlined_call_operand.vmem [shape: f32[2,1,96], index: 8, kind: input, shape index: {}]   ;;  %s3078_s9 = inlined_call_operand.vmem [shape: bf16[2,32,32], index: 9, kind: input, shape index: {}]   ;;  %s3079_s10 = inlined_call_operand.vmem [shape: bf16[2,32,64], index: 10, kind: input, shape index: {}]   ;;  %s3080_s11 = inlined_call_operand.vmem [shape: bf16[2,64,32], index: 11, kind: input, shape index: {}]   ;;  %s3081_s12 = inlined_call_operand.vmem [shape: f32[2,2,128], index: 12, kind: input, shape index: {}]   ;;  %s3082_s13 = inlined_call_operand.vmem [shape: f32[16,32], index: 13, kind: output, shape index: {}]  }
   0x1   :  { %3084 = sst [smem:[#allocation9_spill]] %s3082_s13 }
   0x2   :  { %18 = vsyncpa [#allocation4], 0  ;;  %s26_s27 = sshll.u32 %s3069_s0, 4  ;;  %s27_s27 = int_to_ptr.vmem [resolvable:$true] %s26_s27 }
   0x3   :  { %19 = vsyncpa [#allocation6], 0  ;;  %s36_s30 = sshll.u32 %s3070_s1, 4  ;;  %s2439_s14 = scalar_lea.vmem %s27_s27, 16  ;;  %s37_s30 = int_to_ptr.vmem [resolvable:$true] %s36_s30 }
   0x4   :  { %p2440_p0 = scmp.ne.s32.totalorder %s27_s27, %s2439_s14  ;;  %p2444_p1 = scmp.lt.s32.totalorder %s27_s27, %s27_s27 }
   0x5   :  { %p2445_p2 = scmp.lt.s32.totalorder %s2439_s14, %s2439_s14 }
   0x7   :  { %p2446_p3 = por %p2445_p2, %p2444_p1 }
   0x9   :  { %p2447_p4 = pnand %p2446_p3, %p2440_p0 }
   0xb   :  { %2450 = shalt.err (!%p2447_p4)
}
   0xc   :  { %s2467_s15 = smov [#allocation3]   ;;  %s2451_s16 = scalar_lea.vmem %s37_s30, 16 }
   0xd   :  { %29 = dma.vmem_to_smem %s27_s27, 16, %s2467_s15, [#allocation4]  }
   0xe   :  { %p2452_p5 = scmp.ne.s32.totalorder %s37_s30, %s2451_s16  ;;  %p2456_p6 = scmp.lt.s32.totalorder %s37_s30, %s37_s30 }
   0xf   :  { %p2457_p7 = scmp.lt.s32.totalorder %s2451_s16, %s2451_s16 }
  0x11   :  { %p2458_p8 = por %p2457_p7, %p2456_p6 }
  0x13   :  { %p2459_p9 = pnand %p2458_p8, %p2452_p5 }
  0x15   :  { %2462 = shalt.err (!%p2459_p9)
}
  0x16   :  { %s2468_s0 = smov [#allocation5]  }
  0x17   :  { %39 = dma.vmem_to_smem %s37_s30, 16, %s2468_s0, [#allocation6]  }
  0x18   :  { %2463 = dma.done.wait [#allocation4], 16  }
  0x19   :  { %2464 = vsyncadd [#allocation4], 4294967280 }
  0x1a   :  { %2465 = dma.done.wait [#allocation6], 16  }
  0x1b   :  { %2466 = vsyncadd [#allocation6], 4294967280 }
  0x1c   :  { %68 = sfence }
  0x1d   :  { %s70_s1 = sld [smem:[#allocation3]]  ;;  %vm77_vm0 = vcmask 253952   ;;  %v199_v31 = vld [vmem:[%s3073_s4] sm:$0xff]  ;;  %vm206_vm1 = vcmask 261120   ;;  %v2359_v59 = vld [vmem:[%s3076_s7 + $0x8] sm:$0xff]   ;;  %v2469_v60 = vmov 0.0  }
  0x1e   :  { %s71_s17 = sld [smem:[#allocation5]]  ;;  %2162 = vmatprep.subr.bf16.mxu1 %v2469_v60  ;;  %vm2470_vm2 = vmmov 0   ;;  %v2360_v61 = vld [vmem:[%s3076_s7] sm:$0xff]   ;;  %2176 = vmatprep.subr.bf16.mxu0 %v2469_v60  ;;  %vm370_vm3 = vcmask 130048   ;;  %vm564_vm4 = vcmask 64512   ;;  %vm618_vm5 = vcmask 1043456  }
  0x1f   :  { %s2002_s18 = sld [smem:[#allocation3 + $0x1]]  ;;  %2166 = vmatprep.mubr.msk.bf16.mxu1 %vm2470_vm2, %v2469_v60  ;;  %2163 = vmatpush3.bf16.msra.mxu1 %v2359_v59  ;;  %vm1031_vm6 = vcmask 523264  }
  0x20   :  { %s2003_s19 = sld [smem:[#allocation5 + $0x1]]  ;;  %2164 = vmatprep.subr.bf16.mxu1 %v2469_v60  ;;  %2178 = vmatprep.mubr.msk.bf16.mxu0 %vm2470_vm2, %v2469_v60 }
  0x21   :  { %s2004_s20 = sld [smem:[#allocation3 + $0x2]] }
  0x22   :  { %s2005_s21 = sld [smem:[#allocation5 + $0x2]] }
  0x23   :  { %s72_s24 = scalar_lea.vmem %s3072_s3, %s70_s1  ;;  %s2006_s25 = sld [smem:[#allocation3 + $0x3]]  ;;  %2165 = vmatpush3.bf16.msra.mxu1 %v2360_v61 }
  0x24   :  { %v73_v0 = vld [vmem:[%s72_s24] sm:$0x1]  ;;  %s74_s28 = scalar_lea.vmem %s3074_s5, %s71_s17  ;;  %s2007_s29 = sld [smem:[#allocation5 + $0x3]]  ;;  %2170 = vmatprep.subr.bf16.mxu1 %v2469_v60 }
  0x25   :  { %v75_v1 = vld [vmem:[%s74_s28] sm:$0x1]  ;;  %s81_s15 = scalar_lea.vmem %s3072_s3, %s2002_s18  ;;  %s2008_s16 = sld [smem:[#allocation3 + $0x4]] }
  0x26   :  { %v76_v2 = vadd.f32 %v75_v1, %v73_v0  ;;  %v82_v3 = vld [vmem:[%s81_s15] sm:$0x1]  ;;  %s83_s22 = scalar_lea.vmem %s3074_s5, %s2003_s19  ;;  %s2009_s1 = sld [smem:[#allocation5 + $0x4]] }
  0x27   :  { %v84_v4 = vld [vmem:[%s83_s22] sm:$0x1]  ;;  %s89_s26 = scalar_lea.vmem %s3072_s3, %s2004_s20  ;;  %s2010_s17 = sld [smem:[#allocation3 + $0x5]] }
  0x28   :  { %78 = vst.msk [vmem:[#allocation2] sm:$0x1] %vm77_vm0, %v76_v2  ;;  %v85_v5 = vadd.f32 %v84_v4, %v82_v3  ;;  %v90_v6 = vld [vmem:[%s89_s26] sm:$0x1]  ;;  %s91_s28 = scalar_lea.vmem %s3074_s5, %s2005_s21  ;;  %s2011_s30 = sld [smem:[#allocation5 + $0x5]] }
  0x29   :  { %v92_v7 = vld [vmem:[%s91_s28] sm:$0x1]  ;;  %s97_s19 = scalar_lea.vmem %s3072_s3, %s2006_s25  ;;  %s2012_s15 = sld [smem:[#allocation3 + $0x6]] }
  0x2a   :  { %86 = vst.msk [vmem:[#allocation2 + $0x1] sm:$0x1] %vm77_vm0, %v85_v5  ;;  %v93_v8 = vadd.f32 %v92_v7, %v90_v6  ;;  %v98_v9 = vld [vmem:[%s97_s19] sm:$0x1]  ;;  %s99_s22 = scalar_lea.vmem %s3074_s5, %s2007_s29  ;;  %s2013_s23 = sld [smem:[#allocation5 + $0x6]] }
  0x2b   :  { %v100_v10 = vld [vmem:[%s99_s22] sm:$0x1]  ;;  %s105_s21 = scalar_lea.vmem %s3072_s3, %s2008_s16  ;;  %s2014_s27 = sld [smem:[#allocation3 + $0x7]] }
  0x2c   :  { %94 = vst.msk [vmem:[#allocation2 + $0x2] sm:$0x1] %vm77_vm0, %v93_v8  ;;  %v101_v11 = vadd.f32 %v100_v10, %v98_v9  ;;  %v106_v12 = vld [vmem:[%s105_s21] sm:$0x1]  ;;  %s107_s28 = scalar_lea.vmem %s3074_s5, %s2009_s1  ;;  %s2015_s14 = sld [smem:[#allocation5 + $0x7]] }
  0x2d   :  { %v108_v13 = vld [vmem:[%s107_s28] sm:$0x1]  ;;  %s113_s29 = scalar_lea.vmem %s3072_s3, %s2010_s17  ;;  %s2016_s20 = sld [smem:[#allocation3 + $0x8]] }
  0x2e   :  { %102 = vst.msk [vmem:[#allocation2 + $0x3] sm:$0x1] %vm77_vm0, %v101_v11  ;;  %v109_v14 = vadd.f32 %v108_v13, %v106_v12  ;;  %v114_v15 = vld [vmem:[%s113_s29] sm:$0x1]  ;;  %s115_s22 = scalar_lea.vmem %s3074_s5, %s2011_s30  ;;  %s2017_s24 = sld [smem:[#allocation5 + $0x8]] }
  0x2f   :  { %v116_v16 = vld [vmem:[%s115_s22] sm:$0x1]  ;;  %s121_s1 = scalar_lea.vmem %s3072_s3, %s2012_s15  ;;  %s2018_s25 = sld [smem:[#allocation3 + $0x9]] }
  0x30   :  { %110 = vst.msk [vmem:[#allocation2 + $0x4] sm:$0x1] %vm77_vm0, %v109_v14  ;;  %v117_v17 = vadd.f32 %v116_v16, %v114_v15  ;;  %v122_v18 = vld [vmem:[%s121_s1] sm:$0x1]  ;;  %s123_s28 = scalar_lea.vmem %s3074_s5, %s2013_s23  ;;  %s2019_s13 = sld [smem:[#allocation5 + $0x9]] }
  0x31   :  { %v124_v19 = vld [vmem:[%s123_s28] sm:$0x1]  ;;  %s129_s30 = scalar_lea.vmem %s3072_s3, %s2014_s27  ;;  %s2020_s16 = sld [smem:[#allocation3 + $0xa]] }
  0x32   :  { %118 = vst.msk [vmem:[#allocation2 + $0x5] sm:$0x1] %vm77_vm0, %v117_v17  ;;  %v125_v20 = vadd.f32 %v124_v19, %v122_v18  ;;  %v130_v21 = vld [vmem:[%s129_s30] sm:$0x1]  ;;  %s131_s22 = scalar_lea.vmem %s3074_s5, %s2015_s14  ;;  %s2021_s26 = sld [smem:[#allocation5 + $0xa]] }
  0x33   :  { %v132_v22 = vld [vmem:[%s131_s22] sm:$0x1]  ;;  %s137_s23 = scalar_lea.vmem %s3072_s3, %s2016_s20  ;;  %s2022_s17 = sld [smem:[#allocation3 + $0xb]] }
  0x34   :  { %126 = vst.msk [vmem:[#allocation2 + $0x6] sm:$0x1] %vm77_vm0, %v125_v20  ;;  %v133_v23 = vadd.f32 %v132_v22, %v130_v21  ;;  %v138_v24 = vld [vmem:[%s137_s23] sm:$0x1]  ;;  %s139_s28 = scalar_lea.vmem %s3074_s5, %s2017_s24  ;;  %s2023_s19 = sld [smem:[#allocation5 + $0xb]] }
  0x35   :  { %v140_v25 = vld [vmem:[%s139_s28] sm:$0x1]  ;;  %s145_s14 = scalar_lea.vmem %s3072_s3, %s2018_s25  ;;  %s2024_s15 = sld [smem:[#allocation3 + $0xc]]  ;;  %v2033_v20 = vld [vmem:[%s3075_s6 + $0x1] ss:$0 sm:$0xff] }
  0x36   :  { %134 = vst.msk [vmem:[#allocation2 + $0x7] sm:$0x1] %vm77_vm0, %v133_v23  ;;  %v141_v26 = vadd.f32 %v140_v25, %v138_v24  ;;  %v146_v27 = vld [vmem:[%s145_s14] sm:$0x1]  ;;  %s147_s22 = scalar_lea.vmem %s3074_s5, %s2019_s13  ;;  %s2025_s21 = sld [smem:[#allocation5 + $0xc]] }
  0x37   :  { %v148_v28 = vld [vmem:[%s147_s22] sm:$0x1]  ;;  %s153_s24 = scalar_lea.vmem %s3072_s3, %s2020_s16  ;;  %s2623_s27 = sld [smem:[#allocation3 + $0xd]] }
  0x38   :  { %142 = vst.msk [vmem:[#allocation2 + $0x8] sm:$0x1] %vm77_vm0, %v141_v26  ;;  %v149_v29 = vadd.f32 %v148_v28, %v146_v27  ;;  %v154_v30 = vld [vmem:[%s153_s24] sm:$0x1]  ;;  %s155_s28 = scalar_lea.vmem %s3074_s5, %s2021_s26  ;;  %s2027_s29 = sld [smem:[#allocation5 + $0xd]] }
  0x39   :  { %v156_v32 = vld [vmem:[%s155_s28] sm:$0x1]  ;;  %s161_s16 = scalar_lea.vmem %s3072_s3, %s2022_s17  ;;  %s2635_s0 = sld [smem:[#allocation3 + $0xe]] }
  0x3a   :  { %150 = vst.msk [vmem:[#allocation2 + $0x9] sm:$0x1] %vm77_vm0, %v149_v29  ;;  %v157_v33 = vadd.f32 %v156_v32, %v154_v30  ;;  %v162_v34 = vld [vmem:[%s161_s16] sm:$0x1]  ;;  %s163_s26 = scalar_lea.vmem %s3074_s5, %s2023_s19  ;;  %s2029_s23 = sld [smem:[#allocation5 + $0xe]] }
  0x3b   :  { %v164_v35 = vld [vmem:[%s163_s26] sm:$0x1]  ;;  %s169_s25 = scalar_lea.vmem %s3072_s3, %s2024_s15  ;;  %s2644_s18 = sld [smem:[#allocation3 + $0xf]] }
  0x3c   :  { %158 = vst.msk [vmem:[#allocation2 + $0xa] sm:$0x1] %vm77_vm0, %v157_v33  ;;  %v165_v36 = vadd.f32 %v164_v35, %v162_v34  ;;  %v170_v37 = vld [vmem:[%s169_s25] sm:$0x1]  ;;  %s171_s30 = scalar_lea.vmem %s3074_s5, %s2025_s21  ;;  %s2031_s14 = sld [smem:[#allocation5 + $0xf]] }
  0x3d   :  { %v200_v38 = vld [vmem:[#allocation2] sm:$0xff]  ;;  %s177_s20 = scalar_lea.vmem %s3072_s3, %s2623_s27  ;;  %s2475_s1 = smov 32  }
  0x3e   :  { %v172_v39 = vld [vmem:[%s171_s30] sm:$0x1]  ;;  %v2654_v40 = vadd.f32 %v200_v38, %v199_v31  ;;  %166 = vst.msk [vmem:[#allocation2 + $0xb] sm:$0x1] %vm77_vm0, %v165_v36  ;;  %s179_s22 = scalar_lea.vmem %s3074_s5, %s2027_s29 }
  0x3f   :  { %v173_v41 = vadd.f32 %v172_v39, %v170_v37  ;;  %v178_v42 = vld [vmem:[%s177_s20] sm:$0x1]  ;;  %s185_s26 = scalar_lea.vmem %s3072_s3, %s2635_s0  ;;  %s3085_s20 = sld [smem:[#allocation9_spill]] }
  0x40   :  { %v180_v43 = vld [vmem:[%s179_s22] sm:$0x1]  ;;  %v207_v44 = vsel %vm206_vm1, %v2654_v40, 0.0  ;;  %v216_v45 = vmul.f32 %v2654_v40, %v2654_v40  ;;  %s187_s4 = scalar_lea.vmem %s3074_s5, %s2029_s23  ;;  %s2472_s22 = smov 112  }
  0x41   :  { %174 = vst.msk [vmem:[#allocation2 + $0xc] sm:$0x1] %vm77_vm0, %v173_v41  ;;  %v181_v46 = vadd.f32 %v180_v43, %v178_v42  ;;  %v186_v47 = vld [vmem:[%s185_s26] sm:$0x1]  ;;  %208 = vadd.xlane.f32.xlu0 %v207_v44  ;;  %s193_s0 = scalar_lea.vmem %s3072_s3, %s2644_s18 }
  0x42   :  { %v188_v48 = vld [vmem:[%s187_s4] sm:$0x1]  ;;  %v218_v49 = vsel %vm206_vm1, %v216_v45, 0.0  ;;  %s195_s30 = scalar_lea.vmem %s3074_s5, %s2031_s14 }
  0x43   :  { %182 = vst.msk [vmem:[#allocation2 + $0xd] sm:$0x1] %vm77_vm0, %v181_v46  ;;  %v189_v50 = vadd.f32 %v188_v48, %v186_v47  ;;  %v194_v51 = vld [vmem:[%s193_s0] sm:$0x1]  ;;  %219 = vadd.xlane.f32.xlu1 %v218_v49  ;;  %s2474_s0 = smov 16  }
  0x44   :  { %v196_v52 = vld [vmem:[%s195_s30] sm:$0x1] }
  0x45   :  { %190 = vst.msk [vmem:[#allocation2 + $0xe] sm:$0x1] %vm77_vm0, %v189_v50  ;;  %v197_v53 = vadd.f32 %v196_v52, %v194_v51  ;;  %v2032_v15 = vld [vmem:[%s3075_s6] ss:$0 sm:$0xff]  ;;  %s2471_s6 = smov 96   ;;  %v357_v50 = vlaneseq }
  0x46   :  { %v2034_v25 = vld [vmem:[%s3077_s8] ss:$0 sm:$0xff]  ;;  %v251_v51 = vld [vmem:[%s3071_s2 + $0x1] sm:$0x1] }
  0x47   :  { %198 = vst.msk [vmem:[#allocation2 + $0xf] sm:$0x1] %vm77_vm0, %v197_v53  ;;  %v250_v48 = vld [vmem:[%s3071_s2] sm:$0x1]  ;;  %v2765_v53 = vshrl.u32 %v357_v50, 7  ;;  %s2473_s2 = smov 64  }
  0x48   :  { %v252_v49 = vcvt.s32.f32 %v250_v48 }
  0x4a   :  { %v254_v52 = vsub.f32 1.0, %v252_v49 }
  0x4e   :  { %v201_v54 = vld [vmem:[#allocation2 + $0x8] sm:$0xff] }
  0x4f   :  { %v203_v55 = vadd.f32 %v201_v54, %v199_v31  ;;  %v253_v54 = vcvt.s32.f32 %v251_v51 }
  0x51   :  { %v210_v56 = vsel %vm206_vm1, %v203_v55, 0.0  ;;  %v217_v57 = vmul.f32 %v203_v55, %v203_v55 }
  0x52   :  { %211 = vadd.xlane.f32.xlu0 %v210_v56  ;;  %v2768_v56 = vsub.s32 0, %v2765_v53 }
  0x53   :  { %v221_v58 = vsel %vm206_vm1, %v217_v57, 0.0  ;;  %v255_v57 = vsub.f32 1.0, %v253_v54 }
  0x54   :  { %222 = vadd.xlane.f32.xlu1 %v221_v58 }
  0x55   :  { %v257_v59 = vmul.f32 -1e+09, %v255_v57 }
  0xca   :  { %v209_v62 = vpop.xlane.xlu0 %208 }
  0xcb   :  { %v214_v63 = vmul.f32 0.03125, %v209_v62 }
  0xcc   :  { %v220_v0 = vpop.xlane.xlu1 %219 }
  0xcd   :  { %v226_v1 = vmul.f32 %v214_v63, %v214_v63  ;;  %v224_v2 = vmul.f32 0.03125, %v220_v0  ;;  %v230_v13 = vsub.f32 %v2654_v40, %v214_v63  ;;  %v2775_v63 = vrot.slane %v257_v59, %v2768_v56 }
  0xcf   :  { %v228_v3 = vsub.f32 %v224_v2, %v226_v1 }
  0xd1   :  { %v232_v4 = vadd.f32 1e-12, %v228_v3 }
  0xd3   :  { %2379 = vrsqrt.f32 %v232_v4 }
  0xdb   :  { %v212_v5 = vpop.xlane.xlu0 %211 }
  0xdc   :  { %v215_v6 = vmul.f32 0.03125, %v212_v5 }
  0xdd   :  { %v223_v7 = vpop.xlane.xlu1 %222 }
  0xde   :  { %v227_v8 = vmul.f32 %v215_v6, %v215_v6  ;;  %v225_v9 = vmul.f32 0.03125, %v223_v7  ;;  %v231_v16 = vsub.f32 %v203_v55, %v215_v6  ;;  %v256_v55 = vmul.f32 -1e+09, %v254_v52 }
  0xe0   :  { %v229_v10 = vsub.f32 %v225_v9, %v227_v8  ;;  %v2380_v12 = vpop.eup %2379  ;;  %v2771_v58 = vrot.slane %v256_v55, %v2768_v56 }
  0xe1   :  { %v236_v14 = vmul.f32 %v2380_v12, %v230_v13 }
  0xe2   :  { %v233_v11 = vadd.f32 1e-12, %v229_v10 }
  0xe3   :  { %v242_v19 = vmul.f32 %v2032_v15, %v236_v14 }
  0xe4   :  { %2381 = vrsqrt.f32 %v233_v11 }
  0xe5   :  { %v2706_v22 = vadd.f32 %v2033_v20, %v242_v19 }
  0xf1   :  { %v2382_v17 = vpop.eup %2381 }
  0xf2   :  { %v237_v18 = vmul.f32 %v2382_v17, %v231_v16 }
  0xf4   :  { %v243_v21 = vmul.f32 %v2032_v15, %v237_v18 }
  0xf6   :  { %v2708_v23 = vadd.f32 %v2033_v20, %v243_v21 }
  0xf8   :  { %v280_v24 = vpack.c.bf16 %v2708_v23, %v2706_v22 }
  0xfa   :  { %2167 = vmatmul.mubr.msk.bf16.vlgmr.msra.gmra.mxu1 %vm206_vm1, %v280_v24 }
  0xfb   :  { %2172 = vmatprep.mubr.msk.bf16.mxu1 %vm2470_vm2, %v2469_v60 }
 0x1ba   :  { %v336_v26 = vpop.f32.mrf.mxu1 }
 0x1bb   :  { %v337_v27 = vadd.f32 %v2034_v25, %v336_v26 }
 0x1bc   :  { %v2168_v28 = vpop.f32.mrf.mxu1 }
 0x1bd   :  { %v2718_v29 = vpack.c.bf16 %v337_v27, %v337_v27 }
 0x1be   :  { %v339_v30 = vpop.f32.mrf.mxu1 }
 0x1bf   :  { %v340_v31 = vadd.f32 %v2034_v25, %v339_v30  ;;  %368 = vrot.lane.b32.xlu1 %v2718_v29, %s2471_s6 }
 0x1c0   :  { %v2169_v32 = vpop.f32.mrf.mxu1 }
 0x1c1   :  { %v2339_v33 = vpack.i.bf16 %v340_v31, %v337_v27  ;;  %v2722_v34 = vpack.c.bf16 %v340_v31, %v340_v31 }
 0x1c3   :  { %2340 = vrot.lane.b32.xlu0 %v2339_v33, %s2472_s22  ;;  %418 = vrot.lane.b32.xlu1 %v2722_v34, %s2471_s6 }
 0x231   :  { %v369_v35 = vpop.permute.xlu1 %368 }
 0x232   :  { %v375_v36 = vsel %vm370_vm3, %v369_v35, 0 }
 0x233   :  { %2171 = vmatpush3.bf16.xpose.msra.mxu1 %v375_v36 }
 0x234   :  { %2182 = vmatprep.subr.bf16.mxu1 %v2469_v60 }
 0x235   :  { %v2341_v37 = vpop.permute.xlu0 %2340  ;;  %v419_v38 = vpop.permute.xlu1 %418 }
 0x236   :  { %v2343_v39 = vunpack.i.h.bf16 %v2341_v37  ;;  %v2342_v40 = vunpack.i.l.bf16 %v2341_v37  ;;  %v424_v41 = vsel %vm370_vm3, %v419_v38, 0 }
 0x237   :  { %2177 = vmatpush3.bf16.xpose.msra.mxu0 %v424_v41 }
 0x238   :  { %v2730_v42 = vpack.c.bf16 %v2343_v39, %v2343_v39  ;;  %v2732_v43 = vpack.c.bf16 %v2342_v40, %v2342_v40  ;;  %2188 = vmatprep.subr.bf16.mxu0 %v2469_v60 }
 0x23a   :  { %2173 = vmatmul.mubr.msk.bf16.vlgmr.msra.gmra.mxu1 %vm370_vm3, %v2718_v29  ;;  %516 = vrot.lane.b32.xlu0 %v2730_v42, %s2471_s6 }
 0x23b   :  { %467 = vrot.lane.b32.xlu1 %v2732_v43, %s2471_s6  ;;  %2184 = vmatprep.mubr.msk.bf16.mxu1 %vm2470_vm2, %v2469_v60 }
 0x23e   :  { %2179 = vmatmul.mubr.msk.bf16.vlgmr.msra.gmra.mxu0 %vm370_vm3, %v2722_v34 }
 0x23f   :  { %2190 = vmatprep.mubr.msk.bf16.mxu0 %vm2470_vm2, %v2469_v60 }
 0x2ac   :  { %v517_v44 = vpop.permute.xlu0 %516 }
 0x2ad   :  { %v522_v45 = vsel %vm370_vm3, %v517_v44, 0  ;;  %v468_v46 = vpop.permute.xlu1 %467 }
 0x2ae   :  { %v473_v47 = vsel %vm370_vm3, %v468_v46, 0  ;;  %2189 = vmatpush3.bf16.xpose.msra.mxu0 %v522_v45 }
 0x2af   :  { %2183 = vmatpush3.bf16.xpose.msra.mxu1 %v473_v47  ;;  %2200 = vmatprep.subr.bf16.mxu0 %v2469_v60 }
 0x2b0   :  { %2194 = vmatprep.subr.bf16.mxu1 %v2469_v60 }
 0x2b5   :  { %2191 = vmatmul.mubr.msk.bf16.vlgmr.msra.gmra.mxu0 %vm370_vm3, %v2730_v42 }
 0x2b6   :  { %2185 = vmatmul.mubr.msk.bf16.vlgmr.msra.gmra.mxu1 %vm370_vm3, %v2732_v43  ;;  %2202 = vmatprep.mubr.msk.bf16.mxu0 %vm2470_vm2, %v2469_v60 }
 0x2b7   :  { %2196 = vmatprep.mubr.msk.bf16.mxu1 %vm2470_vm2, %v2469_v60 }
 0x2fa   :  { %v411_v61 = vpop.f32.mrf.mxu1 }
 0x2fb   :  { %v412_v62 = vadd.f32 %v411_v61, %v2771_v58 }
 0x2fc   :  { %v2174_v0 = vpop.f32.mrf.mxu1 }
 0x2fd   :  { %v565_v1 = vsel %vm564_vm4, %v412_v62, -inf }
 0x2fe   :  { %v460_v2 = vpop.f32.mrf.mxu0  ;;  %566 = vmax.xlane.f32.xlu1 %v565_v1  ;;  %v414_v3 = vpop.f32.mrf.mxu1 }
 0x2ff   :  { %v461_v4 = vadd.f32 %v460_v2, %v2775_v63 }
 0x300   :  { %v2175_v5 = vpop.f32.mrf.mxu1  ;;  %v2180_v6 = vpop.f32.mrf.mxu0 }
 0x301   :  { %v568_v7 = vsel %vm564_vm4, %v461_v4, -inf }
 0x302   :  { %569 = vmax.xlane.f32.xlu0 %v568_v7  ;;  %v463_v8 = vpop.f32.mrf.mxu0 }
 0x304   :  { %v2181_v9 = vpop.f32.mrf.mxu0 }
 0x30f   :  { %613 = vrot.lane.b32.xlu1 %v2718_v29, %s2473_s2 }
 0x375   :  { %v558_v10 = vpop.f32.mrf.mxu0 }
 0x376   :  { %v509_v11 = vpop.f32.mrf.mxu1  ;;  %v559_v15 = vadd.f32 %v558_v10, %v2775_v63 }
 0x377   :  { %v510_v12 = vadd.f32 %v509_v11, %v2771_v58  ;;  %v2192_v13 = vpop.f32.mrf.mxu0 }
 0x378   :  { %v2186_v14 = vpop.f32.mrf.mxu1  ;;  %v574_v21 = vsel %vm564_vm4, %v559_v15, -inf  ;;  %v2361_v13 = vld [vmem:[%s3078_s9 + $0x8] sm:$0xff]  }
 0x379   :  { %v561_v16 = vpop.f32.mrf.mxu0  ;;  %v571_v17 = vsel %vm564_vm4, %v510_v12, -inf }
 0x37a   :  { %572 = vmax.xlane.f32.xlu0 %v571_v17  ;;  %v512_v18 = vpop.f32.mrf.mxu1 }
 0x37b   :  { %v2193_v19 = vpop.f32.mrf.mxu0 }
 0x37c   :  { %v2187_v20 = vpop.f32.mrf.mxu1 }
 0x37e   :  { %575 = vmax.xlane.f32.xlu0 %v574_v21 }
 0x387   :  { %v567_v24 = vpop.xlane.xlu1 %566 }
 0x388   :  { %v577_v25 = vsub.f32 %v412_v62, %v567_v24 }
 0x38a   :  { %v581_v26 = vmul.f32 1.442695, %v577_v25 }
 0x38b   :  { %v570_v27 = vpop.xlane.xlu0 %569  ;;  %v614_v28 = vpop.permute.xlu1 %613 }
 0x38c   :  { %2383 = vpow2.f32 %v581_v26  ;;  %v578_v29 = vsub.f32 %v461_v4, %v570_v27  ;;  %v620_v30 = vsel %vm618_vm5, %v614_v28, 0 }
 0x38d   :  { %2195 = vmatpush3.bf16.msra.mxu1 %v620_v30 }
 0x38e   :  { %v583_v31 = vmul.f32 1.442695, %v578_v29  ;;  %2206 = vmatprep.subr.bf16.mxu1 %v2469_v60 }
 0x390   :  { %2385 = vpow2.f32 %v583_v31 }
 0x399   :  { %v2384_v32 = vpop.eup %2383 }
 0x39a   :  { %v589_v33 = vsel %vm564_vm4, %v2384_v32, 0.0 }
 0x39b   :  { %590 = vadd.xlane.f32.xlu1 %v589_v33 }
 0x39d   :  { %v2386_v35 = vpop.eup %2385 }
 0x39e   :  { %v592_v36 = vsel %vm564_vm4, %v2386_v35, 0.0 }
 0x39f   :  { %593 = vadd.xlane.f32.xlu0 %v592_v36 }
 0x403   :  { %v573_v37 = vpop.xlane.xlu0 %572 }
 0x404   :  { %v579_v38 = vsub.f32 %v510_v12, %v573_v37  ;;  %v279_v37 = vld [vmem:[%s3081_s12] sm:$0x3] }
 0x406   :  { %v585_v39 = vmul.f32 1.442695, %v579_v38  ;;  %v2834_v38 = vrot.slane %v279_v37, %v2768_v56 }
 0x407   :  { %v576_v40 = vpop.xlane.xlu0 %575 }
 0x408   :  { %2387 = vpow2.f32 %v585_v39  ;;  %v580_v41 = vsub.f32 %v559_v15, %v576_v40  ;;  %v2362_v15 = vld [vmem:[%s3078_s9] sm:$0xff]  }
 0x40a   :  { %v587_v44 = vmul.f32 1.442695, %v580_v41 }
 0x40c   :  { %2389 = vpow2.f32 %v587_v44 }
 0x415   :  { %v2388_v45 = vpop.eup %2387 }
 0x416   :  { %v595_v46 = vsel %vm564_vm4, %v2388_v45, 0.0 }
 0x417   :  { %596 = vadd.xlane.f32.xlu1 %v595_v46 }
 0x419   :  { %v2390_v47 = vpop.eup %2389 }
 0x41a   :  { %v598_v48 = vsel %vm564_vm4, %v2390_v47, 0.0 }
 0x41b   :  { %599 = vadd.xlane.f32.xlu0 %v598_v48 }
 0x424   :  { %v591_v49 = vpop.xlane.xlu1 %590 }
 0x425   :  { %2391 = vrcp.f32 %v591_v49 }
 0x428   :  { %710 = vrot.lane.b32.xlu1 %v2732_v43, %s2473_s2  ;;  %v594_v54 = vpop.xlane.xlu0 %593 }
 0x429   :  { %2393 = vrcp.f32 %v594_v54 }
 0x42c   :  { %758 = vrot.lane.b32.xlu1 %v2730_v42, %s2473_s2 }
 0x431   :  { %662 = vrot.lane.b32.xlu0 %v2722_v34, %s2473_s2 }
 0x432   :  { %v2392_v50 = vpop.eup %2391 }
 0x433   :  { %v605_v51 = vmul.f32 %v2392_v50, %v2384_v32 }
 0x435   :  { %v609_v52 = vpack.c.bf16 %v605_v51, %v605_v51 }
 0x436   :  { %v2394_v57 = vpop.eup %2393 }
 0x437   :  { %2197 = vmatmul.mubr.msk.bf16.vlgmr.msra.gmra.mxu1 %vm564_vm4, %v609_v52  ;;  %v606_v34 = vmul.f32 %v2394_v57, %v2386_v35  ;;  %v923_v57 = vsub.s32 1, %v2765_v53 }
 0x438   :  { %2208 = vmatprep.mubr.msk.bf16.mxu1 %vm2470_vm2, %v2469_v60 }
 0x439   :  { %v610_v1 = vpack.c.bf16 %v606_v34, %v606_v34 }
 0x4a0   :  { %v597_v55 = vpop.xlane.xlu1 %596 }
 0x4a1   :  { %2395 = vrcp.f32 %v597_v55 }
 0x4a4   :  { %v711_v43 = vpop.permute.xlu1 %710  ;;  %v600_v59 = vpop.xlane.xlu0 %599 }
 0x4a5   :  { %v716_v42 = vsel %vm618_vm5, %v711_v43, 0  ;;  %2397 = vrcp.f32 %v600_v59  ;;  %v2859_v43 = vrot.slane %v279_v37, %v923_v57 }
 0x4a6   :  { %2207 = vmatpush3.bf16.msra.mxu1 %v716_v42 }
 0x4a7   :  { %2218 = vmatprep.subr.bf16.mxu1 %v2469_v60 }
 0x4a8   :  { %v663_v61 = vpop.permute.xlu0 %662  ;;  %v759_v0 = vpop.permute.xlu1 %758 }
 0x4a9   :  { %v668_v62 = vsel %vm618_vm5, %v663_v61, 0  ;;  %v764_v2 = vsel %vm618_vm5, %v759_v0, 0 }
 0x4aa   :  { %2201 = vmatpush3.bf16.msra.mxu0 %v668_v62 }
 0x4ab   :  { %2212 = vmatprep.subr.bf16.mxu0 %v2469_v60 }
 0x4ad   :  { %2203 = vmatmul.mubr.msk.bf16.vlgmr.msra.gmra.mxu0 %vm564_vm4, %v610_v1 }
 0x4ae   :  { %v2396_v3 = vpop.eup %2395  ;;  %2213 = vmatpush3.bf16.msra.mxu0 %v764_v2  ;;  %2214 = vmatprep.mubr.msk.bf16.mxu0 %vm2470_vm2, %v2469_v60 }
 0x4af   :  { %v607_v4 = vmul.f32 %v2396_v3, %v2388_v45  ;;  %2226 = vmatprep.subr.bf16.mxu0 %v2469_v60 }
 0x4b1   :  { %v611_v5 = vpack.c.bf16 %v607_v4, %v607_v4 }
 0x4b2   :  { %v2398_v6 = vpop.eup %2397 }
 0x4b3   :  { %2209 = vmatmul.mubr.msk.bf16.vlgmr.msra.gmra.mxu1 %vm564_vm4, %v611_v5  ;;  %v608_v7 = vmul.f32 %v2398_v6, %v2390_v47 }
 0x4b4   :  { %2222 = vmatprep.mubr.msk.bf16.mxu1 %vm2470_vm2, %v2469_v60  ;;  %2219 = vmatpush3.bf16.msra.mxu1 %v2361_v13 }
 0x4b5   :  { %v612_v8 = vpack.c.bf16 %v608_v7, %v608_v7  ;;  %2220 = vmatprep.subr.bf16.mxu1 %v2469_v60 }
 0x4b7   :  { %2215 = vmatmul.mubr.msk.bf16.vlgmr.msra.gmra.mxu0 %vm564_vm4, %v612_v8 }
 0x4b8   :  { %2230 = vmatprep.mubr.msk.bf16.mxu0 %vm2470_vm2, %v2469_v60  ;;  %2221 = vmatpush3.bf16.msra.mxu1 %v2362_v15 }
 0x4b9   :  { %2234 = vmatprep.subr.bf16.mxu1 %v2469_v60 }
 0x4f7   :  { %v656_v9 = vpop.f32.mrf.mxu1 }
 0x4f9   :  { %v2198_v10 = vpop.f32.mrf.mxu1 }
 0x4fb   :  { %v659_v11 = vpop.f32.mrf.mxu1 }
 0x4fd   :  { %v2199_v12 = vpop.f32.mrf.mxu1 }
 0x56d   :  { %v704_v14 = vpop.f32.mrf.mxu0 }
 0x56f   :  { %v2204_v16 = vpop.f32.mrf.mxu0 }
 0x571   :  { %v707_v17 = vpop.f32.mrf.mxu0 }
 0x573   :  { %v2205_v18 = vpop.f32.mrf.mxu0  ;;  %v752_v19 = vpop.f32.mrf.mxu1 }
 0x575   :  { %v2210_v20 = vpop.f32.mrf.mxu1 }
 0x577   :  { %v755_v21 = vpop.f32.mrf.mxu1  ;;  %v800_v24 = vpop.f32.mrf.mxu0 }
 0x578   :  { %v2344_v25 = vpack.i.bf16 %v800_v24, %v752_v19  ;;  %v2365_v24 = vld [vmem:[%s3080_s11 + $0x18] sm:$0xff]  }
 0x579   :  { %v2211_v26 = vpop.f32.mrf.mxu1  ;;  %v2216_v27 = vpop.f32.mrf.mxu0 }
 0x57a   :  { %2345 = vrot.lane.b32.xlu1 %v2344_v25, %s2474_s0  ;;  %v2366_v25 = vld [vmem:[%s3080_s11 + $0x10] sm:$0xff]   ;;  %v2367_v26 = vld [vmem:[%s3080_s11 + $0x8] sm:$0xff]   ;;  %v2368_v27 = vld [vmem:[%s3080_s11] sm:$0xff]  }
 0x57b   :  { %v803_v28 = vpop.f32.mrf.mxu0 }
 0x57d   :  { %v2217_v29 = vpop.f32.mrf.mxu0 }
 0x5ec   :  { %v2346_v30 = vpop.permute.xlu1 %2345 }
 0x5ed   :  { %v2348_v31 = vunpack.i.h.bf16 %v2346_v30  ;;  %v2347_v32 = vunpack.i.l.bf16 %v2346_v30 }
 0x5ef   :  { %v815_v33 = vsel %vm370_vm3, %v704_v14, %v2348_v31  ;;  %v810_v35 = vsel %vm370_vm3, %v656_v9, %v2347_v32 }
 0x5f0   :  { %v816_v36 = vpack.c.bf16 %v815_v33, %v810_v35 }
 0x5f2   :  { %2223 = vmatmul.mubr.msk.bf16.vlgmr.msra.gmra.mxu1 %vm206_vm1, %v816_v36 }
 0x5f3   :  { %2242 = vmatprep.mubr.msk.bf16.mxu1 %vm2470_vm2, %v2469_v60  ;;  %2235 = vmatpush3.bf16.msra.mxu1 %v2365_v24 }
 0x5f4   :  { %2236 = vmatprep.subr.bf16.mxu1 %v2469_v60 }
 0x5f7   :  { %2237 = vmatpush3.bf16.msra.mxu1 %v2366_v25 }
 0x5f8   :  { %2238 = vmatprep.subr.bf16.mxu1 %v2469_v60 }
 0x5fb   :  { %2239 = vmatpush3.bf16.msra.mxu1 %v2367_v26 }
 0x5fc   :  { %2240 = vmatprep.subr.bf16.mxu1 %v2469_v60 }
 0x5ff   :  { %2241 = vmatpush3.bf16.msra.mxu1 %v2368_v27 }
 0x600   :  { %2260 = vmatprep.subr.bf16.mxu1 %v2469_v60 }
 0x6b2   :  { %v870_v39 = vpop.f32.mrf.mxu1 }
 0x6b3   :  { %v871_v40 = vadd.f32 %v870_v39, %v2834_v38 }
 0x6b4   :  { %v2224_v41 = vpop.f32.mrf.mxu1 }
 0x6b5   :  { %v877_v44 = vadd.f32 %v871_v40, %v2706_v22  ;;  %v2363_v22 = vld [vmem:[%s3079_s10 + $0x8] sm:$0xff]  }
 0x6b6   :  { %v873_v45 = vpop.f32.mrf.mxu1  ;;  %2227 = vmatpush3.bf16.msra.mxu0 %v2363_v22 }
 0x6b7   :  { %v874_v46 = vadd.f32 %v873_v45, %v2834_v38  ;;  %v879_v47 = vsel %vm206_vm1, %v877_v44, 0.0  ;;  %v887_v48 = vmul.f32 %v877_v44, %v877_v44  ;;  %2228 = vmatprep.subr.bf16.mxu0 %v2469_v60 }
 0x6b8   :  { %880 = vadd.xlane.f32.xlu0 %v879_v47  ;;  %v2225_v49 = vpop.f32.mrf.mxu1 }
 0x6b9   :  { %v878_v50 = vadd.f32 %v874_v46, %v2708_v23  ;;  %v889_v51 = vsel %vm206_vm1, %v887_v48, 0.0  ;;  %v2364_v23 = vld [vmem:[%s3079_s10] sm:$0xff]  }
 0x6ba   :  { %2229 = vmatpush3.bf16.msra.mxu0 %v2364_v23 }
 0x6bb   :  { %v882_v52 = vsel %vm206_vm1, %v878_v50, 0.0  ;;  %v888_v54 = vmul.f32 %v878_v50, %v878_v50  ;;  %2246 = vmatprep.subr.bf16.mxu0 %v2469_v60 }
 0x6bc   :  { %890 = vadd.xlane.f32.xlu0 %v889_v51  ;;  %883 = vadd.xlane.f32.xlu1 %v882_v52 }
 0x6bd   :  { %v892_v55 = vsel %vm206_vm1, %v888_v54, 0.0 }
 0x6c0   :  { %893 = vadd.xlane.f32.xlu0 %v892_v55 }
 0x6cd   :  { %915 = vrot.lane.b32.xlu1 %v2834_v38, %s2473_s2 }
 0x6d1   :  { %938 = vrot.lane.b32.xlu1 %v2859_v43, %s2473_s2 }
 0x6d5   :  { %1028 = vrot.lane.b32.xlu1 %v2834_v38, %s2475_s1 }
 0x6d6   :  { %910 = vrot.lane.b32.xlu0 %v2834_v38, %s2471_s6 }
 0x741   :  { %v881_v59 = vpop.xlane.xlu0 %880 }
 0x742   :  { %v885_v42 = vmul.f32 0.03125, %v881_v59 }
 0x744   :  { %v897_v62 = vmul.f32 %v885_v42, %v885_v42  ;;  %v901_v9 = vsub.f32 %v877_v44, %v885_v42 }
 0x745   :  { %v891_v34 = vpop.xlane.xlu0 %890  ;;  %v884_v61 = vpop.xlane.xlu1 %883 }
 0x746   :  { %v895_v0 = vmul.f32 0.03125, %v891_v34  ;;  %v886_v1 = vmul.f32 0.03125, %v884_v61 }
 0x748   :  { %v899_v2 = vsub.f32 %v895_v0, %v897_v62  ;;  %v898_v5 = vmul.f32 %v886_v1, %v886_v1  ;;  %v902_v13 = vsub.f32 %v878_v50, %v886_v1 }
 0x749   :  { %v894_v3 = vpop.xlane.xlu0 %893  ;;  %v916_v17 = vpop.permute.xlu1 %915 }
 0x74a   :  { %v903_v4 = vadd.f32 1e-12, %v899_v2  ;;  %v896_v6 = vmul.f32 0.03125, %v894_v3 }
 0x74c   :  { %2399 = vrsqrt.f32 %v903_v4  ;;  %v900_v7 = vsub.f32 %v896_v6, %v898_v5 }
 0x74d   :  { %v911_v12 = vpop.permute.xlu0 %910  ;;  %v939_v28 = vpop.permute.xlu1 %938 }
 0x74e   :  { %v904_v8 = vadd.f32 1e-12, %v900_v7 }
 0x750   :  { %2401 = vrsqrt.f32 %v904_v8 }
 0x751   :  { %v1029_v59 = vpop.permute.xlu1 %1028 }
 0x759   :  { %v2400_v10 = vpop.eup %2399 }
 0x75a   :  { %v907_v11 = vmul.f32 %v2400_v10, %v901_v9  ;;  %v2369_v10 = vld [vmem:[%s3076_s7 + $0x18] sm:$0xff]  }
 0x75c   :  { %v913_v16 = vmul.f32 %v911_v12, %v907_v11  ;;  %v2370_v11 = vld [vmem:[%s3076_s7 + $0x10] sm:$0xff]  }
 0x75d   :  { %v2402_v14 = vpop.eup %2401 }
 0x75e   :  { %v908_v15 = vmul.f32 %v2402_v14, %v902_v13  ;;  %v918_v19 = vadd.f32 %v916_v17, %v913_v16 }
 0x760   :  { %v914_v18 = vmul.f32 %v911_v12, %v908_v15 }
 0x762   :  { %v919_v20 = vadd.f32 %v916_v17, %v914_v18 }
 0x764   :  { %v920_v21 = vpack.c.bf16 %v919_v20, %v918_v19 }
 0x766   :  { %2231 = vmatmul.mubr.msk.bf16.vlgmr.msra.gmra.mxu0 %vm206_vm1, %v920_v21 }
 0x767   :  { %2250 = vmatprep.mubr.msk.bf16.mxu0 %vm2470_vm2, %v2469_v60  ;;  %2247 = vmatpush3.bf16.msra.mxu0 %v2369_v10 }
 0x768   :  { %2248 = vmatprep.subr.bf16.mxu0 %v2469_v60 }
 0x76b   :  { %2249 = vmatpush3.bf16.msra.mxu0 %v2370_v11 }
 0x76c   :  { %2254 = vmatprep.subr.bf16.mxu0 %v2469_v60 }
 0x826   :  { %v978_v29 = vpop.f32.mrf.mxu0 }
 0x827   :  { %v979_v30 = vadd.f32 %v978_v29, %v939_v28 }
 0x828   :  { %v2232_v31 = vpop.f32.mrf.mxu0 }
 0x829   :  { %v987_v32 = vmul.f32 0.044715, %v979_v30  ;;  %v985_v51 = vmul.f32 0.5, %v979_v30 }
 0x82a   :  { %v981_v33 = vpop.f32.mrf.mxu0 }
 0x82b   :  { %v989_v35 = vmul.f32 %v987_v32, %v979_v30  ;;  %v982_v36 = vadd.f32 %v981_v33, %v939_v28 }
 0x82c   :  { %v2233_v37 = vpop.f32.mrf.mxu0 }
 0x82d   :  { %v991_v39 = vmul.f32 %v989_v35, %v979_v30  ;;  %v988_v40 = vmul.f32 0.044715, %v982_v36  ;;  %v986_v52 = vmul.f32 0.5, %v982_v36 }
 0x82f   :  { %v993_v41 = vadd.f32 %v991_v39, %v979_v30  ;;  %v990_v44 = vmul.f32 %v988_v40, %v982_v36 }
 0x831   :  { %v995_v45 = vmul.f32 0.7978846, %v993_v41  ;;  %v992_v46 = vmul.f32 %v990_v44, %v982_v36 }
 0x833   :  { %2403 = vtanh.f32 %v995_v45  ;;  %v994_v47 = vadd.f32 %v992_v46, %v982_v36  ;;  %v2079_v45 = vld [vmem:[%s3077_s8 + $0x1] ss:$0 sm:$0xff] }
 0x835   :  { %v996_v48 = vmul.f32 0.7978846, %v994_v47 }
 0x837   :  { %2405 = vtanh.f32 %v996_v48 }
 0x840   :  { %v2404_v38 = vpop.eup %2403 }
 0x841   :  { %v999_v49 = vadd.f32 1.0, %v2404_v38 }
 0x843   :  { %v1001_v55 = vmul.f32 %v999_v49, %v985_v51 }
 0x844   :  { %v2406_v50 = vpop.eup %2405 }
 0x845   :  { %v1000_v54 = vadd.f32 1.0, %v2406_v50 }
 0x847   :  { %v1002_v22 = vmul.f32 %v1000_v54, %v986_v52 }
 0x849   :  { %v1003_v23 = vpack.c.bf16 %v1002_v22, %v1001_v55 }
 0x84b   :  { %2243 = vmatmul.mubr.msk.bf16.vlgmr.msra.gmra.mxu1 %vm1031_vm6, %v1003_v23 }
 0x84c   :  { %2262 = vmatprep.mubr.msk.bf16.mxu1 %vm2470_vm2, %v2469_v60 }
 0x90b   :  { %v1069_v42 = vpop.f32.mrf.mxu1 }
 0x90c   :  { %v1070_v34 = vadd.f32 %v1069_v42, %v1029_v59 }
 0x90d   :  { %v2244_v61 = vpop.f32.mrf.mxu1 }
 0x90e   :  { %v1076_v62 = vadd.f32 %v1070_v34, %v918_v19 }
 0x90f   :  { %v1072_v0 = vpop.f32.mrf.mxu1 }
 0x910   :  { %v1073_v1 = vadd.f32 %v1072_v0, %v1029_v59  ;;  %v1078_v2 = vsel %vm206_vm1, %v1076_v62, 0.0  ;;  %v1086_v3 = vmul.f32 %v1076_v62, %v1076_v62 }
 0x911   :  { %1079 = vadd.xlane.f32.xlu0 %v1078_v2  ;;  %v2245_v4 = vpop.f32.mrf.mxu1 }
 0x912   :  { %v1077_v5 = vadd.f32 %v1073_v1, %v919_v20  ;;  %v1088_v6 = vsel %vm206_vm1, %v1086_v3, 0.0 }
 0x914   :  { %v1081_v7 = vsel %vm206_vm1, %v1077_v5, 0.0  ;;  %v1087_v8 = vmul.f32 %v1077_v5, %v1077_v5 }
 0x915   :  { %1089 = vadd.xlane.f32.xlu0 %v1088_v6  ;;  %1082 = vadd.xlane.f32.xlu1 %v1081_v7 }
 0x916   :  { %v1091_v9 = vsel %vm206_vm1, %v1087_v8, 0.0 }
 0x919   :  { %1092 = vadd.xlane.f32.xlu0 %v1091_v9 }
 0x92f   :  { %1110 = vrot.lane.b32.xlu0 %v2859_v43, %s2471_s6 }
 0x99a   :  { %v1080_v12 = vpop.xlane.xlu0 %1079 }
 0x99b   :  { %v1084_v13 = vmul.f32 0.03125, %v1080_v12 }
 0x99d   :  { %v1096_v16 = vmul.f32 %v1084_v13, %v1084_v13  ;;  %v1100_v28 = vsub.f32 %v1076_v62, %v1084_v13 }
 0x99e   :  { %v1090_v14 = vpop.xlane.xlu0 %1089  ;;  %v1083_v15 = vpop.xlane.xlu1 %1082 }
 0x99f   :  { %v1094_v17 = vmul.f32 0.03125, %v1090_v14  ;;  %v1085_v18 = vmul.f32 0.03125, %v1083_v15 }
 0x9a1   :  { %v1098_v19 = vsub.f32 %v1094_v17, %v1096_v16  ;;  %v1097_v24 = vmul.f32 %v1085_v18, %v1085_v18  ;;  %v1101_v31 = vsub.f32 %v1077_v5, %v1085_v18 }
 0x9a2   :  { %v1093_v20 = vpop.xlane.xlu0 %1092 }
 0x9a3   :  { %v1102_v21 = vadd.f32 1e-12, %v1098_v19  ;;  %v1095_v25 = vmul.f32 0.03125, %v1093_v20 }
 0x9a5   :  { %2407 = vrsqrt.f32 %v1102_v21  ;;  %v1099_v26 = vsub.f32 %v1095_v25, %v1097_v24 }
 0x9a6   :  { %v1111_v36 = vpop.permute.xlu0 %1110 }
 0x9a7   :  { %v1103_v27 = vadd.f32 1e-12, %v1099_v26 }
 0x9a9   :  { %2409 = vrsqrt.f32 %v1103_v27 }
 0x9b2   :  { %v2408_v29 = vpop.eup %2407 }
 0x9b3   :  { %v1106_v30 = vmul.f32 %v2408_v29, %v1100_v28 }
 0x9b5   :  { %v1108_v33 = vmul.f32 %v1106_v30, %v2859_v43 }
 0x9b6   :  { %v2410_v32 = vpop.eup %2409 }
 0x9b7   :  { %v1107_v35 = vmul.f32 %v2410_v32, %v1101_v31  ;;  %v2903_v39 = vadd.f32 %v1111_v36, %v1108_v33 }
 0x9b9   :  { %v1109_v37 = vmul.f32 %v1107_v35, %v2859_v43 }
 0x9bb   :  { %v2905_v40 = vadd.f32 %v1111_v36, %v1109_v37 }
 0x9bd   :  { %v1143_v41 = vpack.c.bf16 %v2905_v40, %v2903_v39 }
 0x9bf   :  { %2251 = vmatmul.mubr.msk.bf16.vlgmr.msra.gmra.mxu0 %vm206_vm1, %v1143_v41 }
 0x9c0   :  { %2256 = vmatprep.mubr.msk.bf16.mxu0 %vm2470_vm2, %v2469_v60 }
 0xa7f   :  { %v1199_v44 = vpop.f32.mrf.mxu0 }
 0xa80   :  { %v1200_v43 = vadd.f32 %v2079_v45, %v1199_v44 }
 0xa81   :  { %v2252_v46 = vpop.f32.mrf.mxu0 }
 0xa82   :  { %v2916_v50 = vpack.c.bf16 %v1200_v43, %v1200_v43 }
 0xa83   :  { %v1202_v47 = vpop.f32.mrf.mxu0 }
 0xa84   :  { %v1203_v48 = vadd.f32 %v2079_v45, %v1202_v47 }
 0xa85   :  { %v2253_v38 = vpop.f32.mrf.mxu0 }
 0xa86   :  { %v2349_v49 = vpack.i.bf16 %v1203_v48, %v1200_v43  ;;  %v2920_v51 = vpack.c.bf16 %v1203_v48, %v1203_v48 }
 0xa88   :  { %2350 = vrot.lane.b32.xlu1 %v2349_v49, %s2472_s22 }
 0xa8c   :  { %1219 = vrot.lane.b32.xlu1 %v2916_v50, %s2471_s6 }
 0xa90   :  { %1268 = vrot.lane.b32.xlu1 %v2920_v51, %s2471_s6 }
 0xafa   :  { %v2351_v52 = vpop.permute.xlu1 %2350 }
 0xafb   :  { %v2353_v54 = vunpack.i.h.bf16 %v2351_v52  ;;  %v2352_v55 = vunpack.i.l.bf16 %v2351_v52 }
 0xafd   :  { %v2924_v22 = vpack.c.bf16 %v2353_v54, %v2353_v54  ;;  %v2926_v23 = vpack.c.bf16 %v2352_v55, %v2352_v55 }
 0xafe   :  { %v1220_v59 = vpop.permute.xlu1 %1219 }
 0xaff   :  { %v1225_v42 = vsel %vm370_vm3, %v1220_v59, 0  ;;  %1317 = vrot.lane.b32.xlu0 %v2926_v23, %s2471_s6  ;;  %1366 = vrot.lane.b32.xlu1 %v2924_v22, %s2471_s6 }
 0xb00   :  { %2255 = vmatpush3.bf16.xpose.msra.mxu0 %v1225_v42 }
 0xb01   :  { %2266 = vmatprep.subr.bf16.mxu0 %v2469_v60 }
 0xb02   :  { %v1269_v34 = vpop.permute.xlu1 %1268 }
 0xb03   :  { %v1274_v61 = vsel %vm370_vm3, %v1269_v34, 0 }
 0xb04   :  { %2261 = vmatpush3.bf16.xpose.msra.mxu1 %v1274_v61 }
 0xb05   :  { %2272 = vmatprep.subr.bf16.mxu1 %v2469_v60 }
 0xb07   :  { %2257 = vmatmul.mubr.msk.bf16.vlgmr.msra.gmra.mxu0 %vm370_vm3, %v2916_v50 }
 0xb08   :  { %2268 = vmatprep.mubr.msk.bf16.mxu0 %vm2470_vm2, %v2469_v60 }
 0xb0b   :  { %2263 = vmatmul.mubr.msk.bf16.vlgmr.msra.gmra.mxu1 %vm370_vm3, %v2920_v51 }
 0xb0c   :  { %2274 = vmatprep.mubr.msk.bf16.mxu1 %vm2470_vm2, %v2469_v60 }
 0xb71   :  { %v1318_v62 = vpop.permute.xlu0 %1317  ;;  %v1367_v0 = vpop.permute.xlu1 %1366 }
 0xb72   :  { %v1323_v1 = vsel %vm370_vm3, %v1318_v62, 0  ;;  %v1372_v2 = vsel %vm370_vm3, %v1367_v0, 0 }
 0xb73   :  { %2267 = vmatpush3.bf16.xpose.msra.mxu0 %v1323_v1  ;;  %2273 = vmatpush3.bf16.xpose.msra.mxu1 %v1372_v2 }
 0xb74   :  { %2284 = vmatprep.subr.bf16.mxu1 %v2469_v60  ;;  %2278 = vmatprep.subr.bf16.mxu0 %v2469_v60 }
 0xb7a   :  { %2269 = vmatmul.mubr.msk.bf16.vlgmr.msra.gmra.mxu0 %vm370_vm3, %v2926_v23  ;;  %2275 = vmatmul.mubr.msk.bf16.vlgmr.msra.gmra.mxu1 %vm370_vm3, %v2924_v22 }
 0xb7b   :  { %2286 = vmatprep.mubr.msk.bf16.mxu1 %vm2470_vm2, %v2469_v60  ;;  %2280 = vmatprep.mubr.msk.bf16.mxu0 %vm2470_vm2, %v2469_v60 }
 0xbc7   :  { %v1261_v3 = vpop.f32.mrf.mxu0 }
 0xbc8   :  { %v1262_v4 = vadd.f32 %v1261_v3, %v2771_v58 }
 0xbc9   :  { %v2258_v5 = vpop.f32.mrf.mxu0 }
 0xbca   :  { %v1414_v6 = vsel %vm564_vm4, %v1262_v4, -inf }
 0xbcb   :  { %1415 = vmax.xlane.f32.xlu0 %v1414_v6  ;;  %v1264_v7 = vpop.f32.mrf.mxu0  ;;  %v1310_v8 = vpop.f32.mrf.mxu1 }
 0xbcc   :  { %v1311_v9 = vadd.f32 %v1310_v8, %v2775_v63 }
 0xbcd   :  { %v2259_v10 = vpop.f32.mrf.mxu0  ;;  %v2264_v11 = vpop.f32.mrf.mxu1 }
 0xbce   :  { %v1417_v12 = vsel %vm564_vm4, %v1311_v9, -inf }
 0xbcf   :  { %1418 = vmax.xlane.f32.xlu1 %v1417_v12  ;;  %v1313_v13 = vpop.f32.mrf.mxu1 }
 0xbd0   :  { %v2371_v13 = vld [vmem:[%s3078_s9 + $0x18] sm:$0xff]  }
 0xbd1   :  { %v2265_v14 = vpop.f32.mrf.mxu1 }
 0xc3a   :  { %v1359_v15 = vpop.f32.mrf.mxu0  ;;  %v1408_v16 = vpop.f32.mrf.mxu1 }
 0xc3b   :  { %v1360_v17 = vadd.f32 %v1359_v15, %v2771_v58  ;;  %v1409_v20 = vadd.f32 %v1408_v16, %v2775_v63 }
 0xc3c   :  { %v2270_v18 = vpop.f32.mrf.mxu0  ;;  %v2276_v19 = vpop.f32.mrf.mxu1 }
 0xc3d   :  { %v1420_v21 = vsel %vm564_vm4, %v1360_v17, -inf  ;;  %v1423_v28 = vsel %vm564_vm4, %v1409_v20, -inf }
 0xc3e   :  { %1421 = vmax.xlane.f32.xlu0 %v1420_v21  ;;  %v1362_v24 = vpop.f32.mrf.mxu0  ;;  %v1411_v25 = vpop.f32.mrf.mxu1  ;;  %v2372_v21 = vld [vmem:[%s3078_s9 + $0x10] sm:$0xff]  }
 0xc40   :  { %v2271_v26 = vpop.f32.mrf.mxu0  ;;  %v2277_v27 = vpop.f32.mrf.mxu1 }
 0xc42   :  { %1424 = vmax.xlane.f32.xlu0 %v1423_v28 }
 0xc54   :  { %v1416_v29 = vpop.xlane.xlu0 %1415 }
 0xc55   :  { %v1426_v30 = vsub.f32 %v1262_v4, %v1416_v29 }
 0xc57   :  { %v1430_v31 = vmul.f32 1.442695, %v1426_v30 }
 0xc58   :  { %v1419_v32 = vpop.xlane.xlu1 %1418 }
 0xc59   :  { %2411 = vpow2.f32 %v1430_v31  ;;  %v1427_v58 = vsub.f32 %v1311_v9, %v1419_v32 }
 0xc5b   :  { %v1432_v33 = vmul.f32 1.442695, %v1427_v58 }
 0xc5d   :  { %2413 = vpow2.f32 %v1432_v33 }
 0xc66   :  { %v2412_v35 = vpop.eup %2411 }
 0xc67   :  { %v1438_v63 = vsel %vm564_vm4, %v2412_v35, 0.0 }
 0xc68   :  { %1439 = vadd.xlane.f32.xlu0 %v1438_v63 }
 0xc6a   :  { %v2414_v36 = vpop.eup %2413 }
 0xc6b   :  { %v1441_v37 = vsel %vm564_vm4, %v2414_v36, 0.0 }
 0xc6c   :  { %1442 = vadd.xlane.f32.xlu1 %v1441_v37 }
 0xc7d   :  { %1510 = vrot.lane.b32.xlu1 %v2920_v51, %s2473_s2 }
 0xc81   :  { %1558 = vrot.lane.b32.xlu1 %v2926_v23, %s2473_s2 }
 0xcc7   :  { %v1422_v41 = vpop.xlane.xlu0 %1421 }
 0xcc8   :  { %v1428_v44 = vsub.f32 %v1360_v17, %v1422_v41 }
 0xcca   :  { %v1434_v45 = vmul.f32 1.442695, %v1428_v44  ;;  %v2078_v44 = vld [vmem:[%s3081_s12 + $0x2] sm:$0x3] }
 0xccb   :  { %v1425_v46 = vpop.xlane.xlu0 %1424 }
 0xccc   :  { %2415 = vpow2.f32 %v1434_v45  ;;  %v1429_v47 = vsub.f32 %v1409_v20, %v1425_v46  ;;  %v1668_v45 = vrot.slane %v2078_v44, %v2768_v56 }
 0xcce   :  { %v1436_v43 = vmul.f32 1.442695, %v1429_v47 }
 0xcd0   :  { %2417 = vpow2.f32 %v1436_v43 }
 0xcd9   :  { %v2416_v48 = vpop.eup %2415 }
 0xcda   :  { %v1444_v38 = vsel %vm564_vm4, %v2416_v48, 0.0 }
 0xcdb   :  { %1445 = vadd.xlane.f32.xlu0 %v1444_v38 }
 0xcdd   :  { %v2418_v49 = vpop.eup %2417 }
 0xcde   :  { %v1447_v52 = vsel %vm564_vm4, %v2418_v49, 0.0 }
 0xcdf   :  { %1448 = vadd.xlane.f32.xlu1 %v1447_v52 }
 0xcf0   :  { %1606 = vrot.lane.b32.xlu1 %v2924_v22, %s2473_s2 }
 0xcf1   :  { %1462 = vrot.lane.b32.xlu0 %v2916_v50, %s2473_s2  ;;  %v1440_v22 = vpop.xlane.xlu0 %1439 }
 0xcf5   :  { %v1443_v51 = vpop.xlane.xlu1 %1442 }
 0xcf6   :  { %2419 = vrcp.f32 %v1443_v51 }
 0xcf7   :  { %2421 = vrcp.f32 %v1440_v22  ;;  %v3031_v22 = vrot.slane %v2078_v44, %v923_v57 }
 0xcf9   :  { %v1511_v54 = vpop.permute.xlu1 %1510 }
 0xcfa   :  { %v1516_v55 = vsel %vm618_vm5, %v1511_v54, 0 }
 0xcfb   :  { %2285 = vmatpush3.bf16.msra.mxu1 %v1516_v55 }
 0xcfc   :  { %2296 = vmatprep.subr.bf16.mxu1 %v2469_v60 }
 0xcfd   :  { %v1559_v50 = vpop.permute.xlu1 %1558 }
 0xcfe   :  { %v1564_v5 = vsel %vm618_vm5, %v1559_v50, 0 }
 0xd03   :  { %v2420_v23 = vpop.eup %2419 }
 0xd04   :  { %v1455_v59 = vmul.f32 %v2420_v23, %v2414_v36  ;;  %v2422_v34 = vpop.eup %2421 }
 0xd05   :  { %v1454_v62 = vmul.f32 %v2422_v34, %v2412_v35 }
 0xd06   :  { %v1459_v42 = vpack.c.bf16 %v1455_v59, %v1455_v59 }
 0xd07   :  { %v1458_v3 = vpack.c.bf16 %v1454_v62, %v1454_v62 }
 0xd08   :  { %2287 = vmatmul.mubr.msk.bf16.vlgmr.msra.gmra.mxu1 %vm564_vm4, %v1459_v42 }
 0xd09   :  { %2298 = vmatprep.mubr.msk.bf16.mxu1 %vm2470_vm2, %v2469_v60 }
 0xd64   :  { %v1446_v61 = vpop.xlane.xlu0 %1445 }
 0xd65   :  { %2423 = vrcp.f32 %v1446_v61 }
 0xd68   :  { %v1449_v0 = vpop.xlane.xlu1 %1448  ;;  %v1463_v1 = vpop.permute.xlu0 %1462 }
 0xd69   :  { %2425 = vrcp.f32 %v1449_v0  ;;  %v1468_v2 = vsel %vm618_vm5, %v1463_v1, 0 }
 0xd6a   :  { %2279 = vmatpush3.bf16.msra.mxu0 %v1468_v2 }
 0xd6b   :  { %2290 = vmatprep.subr.bf16.mxu0 %v2469_v60 }
 0xd6c   :  { %v1607_v4 = vpop.permute.xlu1 %1606 }
 0xd6d   :  { %v1612_v6 = vsel %vm618_vm5, %v1607_v4, 0  ;;  %2281 = vmatmul.mubr.msk.bf16.vlgmr.msra.gmra.mxu0 %vm564_vm4, %v1458_v3 }
 0xd6e   :  { %2291 = vmatpush3.bf16.msra.mxu0 %v1564_v5  ;;  %2297 = vmatpush3.bf16.msra.mxu1 %v1612_v6 }
 0xd6f   :  { %2292 = vmatprep.mubr.msk.bf16.mxu0 %vm2470_vm2, %v2469_v60  ;;  %2302 = vmatprep.subr.bf16.mxu0 %v2469_v60 }
 0xd70   :  { %2310 = vmatprep.subr.bf16.mxu1 %v2469_v60 }
 0xd72   :  { %v2424_v7 = vpop.eup %2423 }
 0xd73   :  { %v1456_v8 = vmul.f32 %v2424_v7, %v2416_v48 }
 0xd75   :  { %v1460_v9 = vpack.c.bf16 %v1456_v8, %v1456_v8 }
 0xd76   :  { %v2426_v10 = vpop.eup %2425 }
 0xd77   :  { %2293 = vmatmul.mubr.msk.bf16.vlgmr.msra.gmra.mxu0 %vm564_vm4, %v1460_v9  ;;  %v1457_v11 = vmul.f32 %v2426_v10, %v2418_v49 }
 0xd78   :  { %2306 = vmatprep.mubr.msk.bf16.mxu0 %vm2470_vm2, %v2469_v60  ;;  %2303 = vmatpush3.bf16.msra.mxu0 %v2371_v13 }
 0xd79   :  { %v1461_v12 = vpack.c.bf16 %v1457_v11, %v1457_v11  ;;  %2304 = vmatprep.subr.bf16.mxu0 %v2469_v60 }
 0xd7b   :  { %2299 = vmatmul.mubr.msk.bf16.vlgmr.msra.gmra.mxu1 %vm564_vm4, %v1461_v12 }
 0xd7c   :  { %2314 = vmatprep.mubr.msk.bf16.mxu1 %vm2470_vm2, %v2469_v60  ;;  %2305 = vmatpush3.bf16.msra.mxu0 %v2372_v21  ;;  %v2375_v21 = vld [vmem:[%s3080_s11 + $0x38] sm:$0xff]  }
 0xd7d   :  { %2318 = vmatprep.subr.bf16.mxu0 %v2469_v60 }
 0xdc8   :  { %v1552_v14 = vpop.f32.mrf.mxu1 }
 0xdca   :  { %v2288_v15 = vpop.f32.mrf.mxu1 }
 0xdcc   :  { %v1555_v16 = vpop.f32.mrf.mxu1 }
 0xdce   :  { %v2289_v17 = vpop.f32.mrf.mxu1 }
 0xe2d   :  { %v1504_v18 = vpop.f32.mrf.mxu0 }
 0xe2f   :  { %v2282_v19 = vpop.f32.mrf.mxu0 }
 0xe31   :  { %v1507_v20 = vpop.f32.mrf.mxu0 }
 0xe33   :  { %v2283_v24 = vpop.f32.mrf.mxu0 }
 0xe34   :  { %v2376_v24 = vld [vmem:[%s3080_s11 + $0x30] sm:$0xff]  }
 0xe37   :  { %v1600_v25 = vpop.f32.mrf.mxu0 }
 0xe39   :  { %v2294_v26 = vpop.f32.mrf.mxu0 }
 0xe3a   :  { %v2378_v26 = vld [vmem:[%s3080_s11 + $0x20] sm:$0xff]  }
 0xe3b   :  { %v1603_v27 = vpop.f32.mrf.mxu0  ;;  %v1648_v28 = vpop.f32.mrf.mxu1 }
 0xe3c   :  { %v2354_v29 = vpack.i.bf16 %v1648_v28, %v1600_v25  ;;  %v2377_v25 = vld [vmem:[%s3080_s11 + $0x28] sm:$0xff]  }
 0xe3d   :  { %v2295_v30 = vpop.f32.mrf.mxu0  ;;  %v2300_v31 = vpop.f32.mrf.mxu1 }
 0xe3e   :  { %2355 = vrot.lane.b32.xlu0 %v2354_v29, %s2474_s0 }
 0xe3f   :  { %v1651_v32 = vpop.f32.mrf.mxu1 }
 0xe41   :  { %v2301_v58 = vpop.f32.mrf.mxu1 }
 0xeb0   :  { %v2356_v33 = vpop.permute.xlu0 %2355 }
 0xeb1   :  { %v2358_v35 = vunpack.i.h.bf16 %v2356_v33  ;;  %v2357_v63 = vunpack.i.l.bf16 %v2356_v33 }
 0xeb3   :  { %v1663_v36 = vsel %vm370_vm3, %v1552_v14, %v2358_v35  ;;  %v1658_v37 = vsel %vm370_vm3, %v1504_v18, %v2357_v63 }
 0xeb4   :  { %v1664_v41 = vpack.c.bf16 %v1663_v36, %v1658_v37 }
 0xeb6   :  { %2307 = vmatmul.mubr.msk.bf16.vlgmr.msra.gmra.mxu0 %vm206_vm1, %v1664_v41 }
 0xeb7   :  { %2326 = vmatprep.mubr.msk.bf16.mxu0 %vm2470_vm2, %v2469_v60  ;;  %2319 = vmatpush3.bf16.msra.mxu0 %v2375_v21 }
 0xeb8   :  { %2320 = vmatprep.subr.bf16.mxu0 %v2469_v60 }
 0xebb   :  { %2321 = vmatpush3.bf16.msra.mxu0 %v2376_v24 }
 0xebc   :  { %2322 = vmatprep.subr.bf16.mxu0 %v2469_v60 }
 0xebf   :  { %2323 = vmatpush3.bf16.msra.mxu0 %v2377_v25 }
 0xec0   :  { %2324 = vmatprep.subr.bf16.mxu0 %v2469_v60 }
 0xec3   :  { %2325 = vmatpush3.bf16.msra.mxu0 %v2378_v26 }
 0xf76   :  { %v1718_v46 = vpop.f32.mrf.mxu0 }
 0xf77   :  { %v1719_v47 = vadd.f32 %v1718_v46, %v1668_v45 }
 0xf78   :  { %v2308_v43 = vpop.f32.mrf.mxu0 }
 0xf79   :  { %v1725_v48 = vadd.f32 %v1719_v47, %v2903_v39  ;;  %v2373_v39 = vld [vmem:[%s3079_s10 + $0x18] sm:$0xff]  }
 0xf7a   :  { %v1721_v38 = vpop.f32.mrf.mxu0  ;;  %2311 = vmatpush3.bf16.msra.mxu1 %v2373_v39 }
 0xf7b   :  { %v1722_v49 = vadd.f32 %v1721_v38, %v1668_v45  ;;  %v1727_v52 = vsel %vm206_vm1, %v1725_v48, 0.0  ;;  %v1735_v51 = vmul.f32 %v1725_v48, %v1725_v48  ;;  %2312 = vmatprep.subr.bf16.mxu1 %v2469_v60 }
 0xf7c   :  { %1728 = vadd.xlane.f32.xlu1 %v1727_v52  ;;  %v2309_v54 = vpop.f32.mrf.mxu0 }
 0xf7d   :  { %v1726_v55 = vadd.f32 %v1722_v49, %v2905_v40  ;;  %v1737_v23 = vsel %vm206_vm1, %v1735_v51, 0.0  ;;  %v2374_v40 = vld [vmem:[%s3079_s10 + $0x10] sm:$0xff]  }
 0xf7e   :  { %1738 = vadd.xlane.f32.xlu0 %v1737_v23  ;;  %2313 = vmatpush3.bf16.msra.mxu1 %v2374_v40 }
 0xf7f   :  { %v1730_v59 = vsel %vm206_vm1, %v1726_v55, 0.0  ;;  %v1736_v56 = vmul.f32 %v1726_v55, %v1726_v55 }
 0xf81   :  { %v1740_v42 = vsel %vm206_vm1, %v1736_v56, 0.0 }
 0xf82   :  { %1731 = vadd.xlane.f32.xlu0 %v1730_v59 }
 0xf86   :  { %1741 = vadd.xlane.f32.xlu0 %v1740_v42 }
 0xf8d   :  { %1758 = vrot.lane.b32.xlu1 %v1668_v45, %s2471_s6 }
 0xf91   :  { %1786 = vrot.lane.b32.xlu1 %v3031_v22, %s2473_s2 }
 0xf95   :  { %1876 = vrot.lane.b32.xlu1 %v1668_v45, %s2475_s1 }
 0xf9c   :  { %1763 = vrot.lane.b32.xlu0 %v1668_v45, %s2473_s2 }
0x1005   :  { %v1729_v34 = vpop.xlane.xlu1 %1728 }
0x1006   :  { %v1733_v50 = vmul.f32 0.03125, %v1729_v34 }
0x1007   :  { %v1739_v61 = vpop.xlane.xlu0 %1738 }
0x1008   :  { %v1745_v62 = vmul.f32 %v1733_v50, %v1733_v50  ;;  %v1743_v0 = vmul.f32 0.03125, %v1739_v61  ;;  %v1749_v9 = vsub.f32 %v1725_v48, %v1733_v50 }
0x1009   :  { %v1759_v11 = vpop.permute.xlu1 %1758 }
0x100a   :  { %v1747_v1 = vsub.f32 %v1743_v0, %v1745_v62 }
0x100b   :  { %v1732_v2 = vpop.xlane.xlu0 %1731 }
0x100c   :  { %v1751_v3 = vadd.f32 1e-12, %v1747_v1  ;;  %v1734_v4 = vmul.f32 0.03125, %v1732_v2 }
0x100d   :  { %v1787_v27 = vpop.permute.xlu1 %1786 }
0x100e   :  { %2427 = vrsqrt.f32 %v1751_v3  ;;  %v1746_v6 = vmul.f32 %v1734_v4, %v1734_v4  ;;  %v1750_v12 = vsub.f32 %v1726_v55, %v1734_v4 }
0x100f   :  { %v1742_v5 = vpop.xlane.xlu0 %1741 }
0x1010   :  { %v1744_v53 = vmul.f32 0.03125, %v1742_v5 }
0x1011   :  { %v1877_v23 = vpop.permute.xlu1 %1876 }
0x1012   :  { %v1748_v57 = vsub.f32 %v1744_v53, %v1746_v6 }
0x1013   :  { %v1764_v16 = vpop.permute.xlu0 %1763 }
0x1014   :  { %v1752_v7 = vadd.f32 1e-12, %v1748_v57 }
0x1016   :  { %2429 = vrsqrt.f32 %v1752_v7 }
0x101b   :  { %v2428_v8 = vpop.eup %2427 }
0x101c   :  { %v1755_v10 = vmul.f32 %v2428_v8, %v1749_v9 }
0x101e   :  { %v1761_v15 = vmul.f32 %v1759_v11, %v1755_v10 }
0x1020   :  { %v1766_v18 = vadd.f32 %v1764_v16, %v1761_v15 }
0x1023   :  { %v2430_v13 = vpop.eup %2429 }
0x1024   :  { %v1756_v14 = vmul.f32 %v2430_v13, %v1750_v12 }
0x1026   :  { %v1762_v17 = vmul.f32 %v1759_v11, %v1756_v14 }
0x1028   :  { %v1767_v19 = vadd.f32 %v1764_v16, %v1762_v17 }
0x102a   :  { %v1768_v20 = vpack.c.bf16 %v1767_v19, %v1766_v18 }
0x102c   :  { %2315 = vmatmul.mubr.msk.bf16.vlgmr.msra.gmra.mxu1 %vm206_vm1, %v1768_v20 }
0x10ec   :  { %v1826_v28 = vpop.f32.mrf.mxu1 }
0x10ed   :  { %v1827_v29 = vadd.f32 %v1826_v28, %v1787_v27 }
0x10ee   :  { %v2316_v30 = vpop.f32.mrf.mxu1 }
0x10ef   :  { %v1835_v31 = vmul.f32 0.044715, %v1827_v29  ;;  %v1833_v38 = vmul.f32 0.5, %v1827_v29 }
0x10f0   :  { %v1829_v32 = vpop.f32.mrf.mxu1 }
0x10f1   :  { %v1837_v58 = vmul.f32 %v1835_v31, %v1827_v29  ;;  %v1830_v33 = vadd.f32 %v1829_v32, %v1787_v27 }
0x10f2   :  { %v2317_v35 = vpop.f32.mrf.mxu1 }
0x10f3   :  { %v1839_v63 = vmul.f32 %v1837_v58, %v1827_v29  ;;  %v1836_v36 = vmul.f32 0.044715, %v1830_v33  ;;  %v1834_v49 = vmul.f32 0.5, %v1830_v33 }
0x10f5   :  { %v1841_v37 = vadd.f32 %v1839_v63, %v1827_v29  ;;  %v1838_v41 = vmul.f32 %v1836_v36, %v1830_v33 }
0x10f7   :  { %v1843_v44 = vmul.f32 0.7978846, %v1841_v37  ;;  %v1840_v45 = vmul.f32 %v1838_v41, %v1830_v33 }
0x10f9   :  { %2431 = vtanh.f32 %v1843_v44  ;;  %v1842_v46 = vadd.f32 %v1840_v45, %v1830_v33 }
0x10fb   :  { %v1844_v47 = vmul.f32 0.7978846, %v1842_v46 }
0x10fd   :  { %2433 = vtanh.f32 %v1844_v47 }
0x1106   :  { %v2432_v60 = vpop.eup %2431 }
0x1107   :  { %v1847_v43 = vadd.f32 1.0, %v2432_v60 }
0x1109   :  { %v1849_v51 = vmul.f32 %v1847_v43, %v1833_v38 }
0x110a   :  { %v2434_v48 = vpop.eup %2433 }
0x110b   :  { %v1848_v52 = vadd.f32 1.0, %v2434_v48 }
0x110d   :  { %v1850_v54 = vmul.f32 %v1848_v52, %v1834_v49 }
0x110f   :  { %v1851_v55 = vpack.c.bf16 %v1850_v54, %v1849_v51 }
0x1111   :  { %2327 = vmatmul.mubr.msk.bf16.vlgmr.msra.gmra.mxu0 %vm1031_vm6, %v1851_v55 }
0x11d1   :  { %v1916_v59 = vpop.f32.mrf.mxu0 }
0x11d2   :  { %v1917_v56 = vadd.f32 %v1916_v59, %v1877_v23 }
0x11d3   :  { %v2328_v42 = vpop.f32.mrf.mxu0 }
0x11d4   :  { %v1923_v39 = vadd.f32 %v1917_v56, %v1766_v18 }
0x11d5   :  { %v1919_v40 = vpop.f32.mrf.mxu0 }
0x11d6   :  { %v1920_v34 = vadd.f32 %v1919_v40, %v1877_v23  ;;  %v1925_v50 = vsel %vm206_vm1, %v1923_v39, 0.0  ;;  %v1933_v61 = vmul.f32 %v1923_v39, %v1923_v39 }
0x11d7   :  { %1926 = vadd.xlane.f32.xlu1 %v1925_v50  ;;  %v2329_v62 = vpop.f32.mrf.mxu0 }
0x11d8   :  { %v1924_v0 = vadd.f32 %v1920_v34, %v1767_v19  ;;  %v1935_v1 = vsel %vm206_vm1, %v1933_v61, 0.0 }
0x11d9   :  { %1936 = vadd.xlane.f32.xlu0 %v1935_v1 }
0x11da   :  { %v1928_v2 = vsel %vm206_vm1, %v1924_v0, 0.0  ;;  %v1934_v3 = vmul.f32 %v1924_v0, %v1924_v0 }
0x11dc   :  { %v1938_v4 = vsel %vm206_vm1, %v1934_v3, 0.0 }
0x11dd   :  { %1929 = vadd.xlane.f32.xlu0 %v1928_v2 }
0x11e1   :  { %1939 = vadd.xlane.f32.xlu0 %v1938_v4 }
0x11e8   :  { %1957 = vrot.lane.b32.xlu1 %v3031_v22, %s2471_s6 }
0x1260   :  { %v1927_v5 = vpop.xlane.xlu1 %1926 }
0x1261   :  { %v1931_v6 = vmul.f32 0.03125, %v1927_v5 }
0x1262   :  { %v1937_v53 = vpop.xlane.xlu0 %1936 }
0x1263   :  { %v1943_v57 = vmul.f32 %v1931_v6, %v1931_v6  ;;  %v1941_v7 = vmul.f32 0.03125, %v1937_v53  ;;  %v1947_v17 = vsub.f32 %v1923_v39, %v1931_v6 }
0x1264   :  { %v1958_v20 = vpop.permute.xlu1 %1957 }
0x1265   :  { %v1945_v8 = vsub.f32 %v1941_v7, %v1943_v57 }
0x1266   :  { %v1930_v9 = vpop.xlane.xlu0 %1929 }
0x1267   :  { %v1949_v10 = vadd.f32 1e-12, %v1945_v8  ;;  %v1932_v11 = vmul.f32 0.03125, %v1930_v9 }
0x1269   :  { %2435 = vrsqrt.f32 %v1949_v10  ;;  %v1944_v13 = vmul.f32 %v1932_v11, %v1932_v11  ;;  %v1948_v25 = vsub.f32 %v1924_v0, %v1932_v11 }
0x126a   :  { %v1940_v12 = vpop.xlane.xlu0 %1939 }
0x126b   :  { %v1942_v14 = vmul.f32 0.03125, %v1940_v12 }
0x126d   :  { %v1946_v15 = vsub.f32 %v1942_v14, %v1944_v13 }
0x126f   :  { %v1950_v16 = vadd.f32 1e-12, %v1946_v15 }
0x1271   :  { %2437 = vrsqrt.f32 %v1950_v16 }
0x1276   :  { %v2436_v18 = vpop.eup %2435 }
0x1277   :  { %v1953_v19 = vmul.f32 %v2436_v18, %v1947_v17 }
0x1279   :  { %v1955_v21 = vmul.f32 %v1953_v19, %v3031_v22 }
0x127b   :  { %v1960_v24 = vadd.f32 %v1958_v20, %v1955_v21 }
0x127d   :  { %1962 = vst.msk [vmem:[%s3085_s20] sm:$0xff] %vm206_vm1, %v1960_v24 }
0x127e   :  { %v2438_v26 = vpop.eup %2437 }
0x127f   :  { %v1954_v27 = vmul.f32 %v2438_v26, %v1948_v25 }
0x1281   :  { %v1956_v28 = vmul.f32 %v1954_v27, %v3031_v22 }
0x1283   :  { %v1961_v29 = vadd.f32 %v1958_v20, %v1956_v28 }
0x1285   :  { %1963 = vst.msk [vmem:[%s3085_s20 + $0x8] sm:$0xff] %vm206_vm1, %v1961_v29 }
0x1286   :  { %1968 = vsyncpa [#allocation4], 1 }
0x1287   :  { %1969 = vsyncpa [#allocation6], 1 }

</bundles_post_ra>
